<compile_context>
chip_gen: v5e
topology: v5e:2x2
jax: 0.10.0
libtpu: 0.0.40
codegen_flags: <defaults>
</compile_context>

<pallas_src>
import functools

import jax
import jax.numpy as jnp
from jax.experimental import pallas as pl
from jax.experimental.pallas import tpu as pltpu

BN_EPS = 1e-5              # nn.BatchNorm1d default eps
EPS = 1e-8                 # mmAAVI module-level EPS added to softplus(sigma)
MXU_DTYPE = jnp.bfloat16   # MXU operand dtype; accumulation stays float32


def _round_up(x, m):
    return (x + m - 1) // m * m


def _vmem_capacity_bytes():
    try:
        return int(pltpu.get_tpu_info().vmem_capacity_bytes)
    except Exception:
        return 64 * 1024 * 1024      # conservative: v7x physical VMEM per core


_VMEM_PHYSICAL_BYTES = _vmem_capacity_bytes()


def _softplus(x):
    # numerically stable softplus (EUP exp/log, VPU rest)
    return jnp.maximum(x, 0.0) + jnp.log(1.0 + jnp.exp(-jnp.abs(x)))


def _mlp_kernel(x_ref, cc_ref, dc_ref, w1x_ref, w2_ref, w3_ref, aux_ref,
                out_ref, h1s_ref, h2s_ref, st_ref,
                *, n_rows, tile_n, need_mask, ccw, dcov_dims, outc):
    """Feature-major three-phase kernel, grid = (3, num_lane_tiles).

    Everything is transposed: activations are (features, batch) so batch is
    lane-dense.  st_ref columns: [0]=sum1 [1]=sumsq1 [2]=scale1 [3]=shift1
    [4]=sum2 [5]=sumsq2 [6]=scale2 [7]=shift2.  aux columns:
    [0:ccw]=W1c^T  [ccw:ccw+sum_d]=W1d^T  then g1, bt1, g2, bt2, b3.
    """
    p = pl.program_id(0)              # phase
    t = pl.program_id(1)              # lane (batch) tile
    nt = pl.num_programs(1)
    is_last = t == nt - 1
    out_total = 2 * outc

    col0 = pl.multiple_of(t * tile_n, tile_n)
    inv_n = 1.0 / float(n_rows)

    sum_d = sum(dcov_dims)
    g1_col = ccw + sum_d
    bt1_col, g2_col, bt2_col, b3_col = (g1_col + 1, g1_col + 2,
                                        g1_col + 3, g1_col + 4)

    aux = aux_ref[...]                # (hidden, ccw+sum_d+5) f32, tiny

    def accum(h, c):
        # fused (sum | sum-of-squares) read-modify-write  (one narrow RMW/tile)
        s = jnp.sum(h, axis=1, keepdims=True)
        sq = jnp.sum(h * h, axis=1, keepdims=True)
        st_ref[:, c:c + 2] += jnp.concatenate([s, sq], axis=1)

    def accum_stats(h, c):
        # validity mask only on the last (batch-padded) tile
        if not need_mask:
            accum(h, c)
        else:
            @pl.when(t != nt - 1)
            def _():
                accum(h, c)

            @pl.when(is_last)
            def _():
                lane = jax.lax.broadcasted_iota(jnp.int32, (1, tile_n), 1)
                valid = ((col0 + lane) < n_rows).astype(jnp.float32)
                accum(h * valid, c)

    def finalize_stats(sum_col, gamma_col, beta_col, out_col):
        # single-pass batch stats: biased var = E[h^2] - mean^2 (clamped >= 0).
        # NOTE: cancellation-prone if |mean| >> std; fine at these widths.
        mean = st_ref[:, sum_col:sum_col + 1] * inv_n
        var = jnp.maximum(st_ref[:, sum_col + 1:sum_col + 2] * inv_n
                          - mean * mean, 0.0)
        scale = aux[:, gamma_col:gamma_col + 1] * jax.lax.rsqrt(var + BN_EPS)
        shift = aux[:, beta_col:beta_col + 1] - mean * scale
        st_ref[:, out_col:out_col + 2] = jnp.concatenate([scale, shift], axis=1)

    @pl.when(p == 0)
    def _phase0():
        @pl.when(t == 0)
        def _():
            st_ref[...] = jnp.zeros_like(st_ref)

        # layer-1 pre-BN, fused concat + one-hot, split per execution unit:
        #   x     (K=16) -> MXU bf16 dot
        #   ccov  (K=3)  -> VPU broadcast multiply-adds of W1c^T columns
        #   dcov  (K=4)  -> VPU one-hot-free column adds of W1d^T
        # Linear bias b1 omitted: training-mode BN mean-subtraction cancels it.
        h1 = jnp.dot(w1x_ref[...], x_ref[...].astype(MXU_DTYPE),
                     preferred_element_type=jnp.float32)        # (hidden, tile_n)
        cc = cc_ref[...]                                        # (ccw, tile_n) f32
        for j in range(ccw):
            h1 = h1 + aux[:, j:j + 1] * cc[j:j + 1, :]
        dc = dc_ref[...]                                        # (n_dcov, tile_n) i32
        off = ccw
        for k, d in enumerate(dcov_dims):
            dck = dc[k:k + 1, :]
            for j in range(d):
                oh = (dck == j).astype(jnp.float32)             # (1, tile_n)
                h1 = h1 + oh * aux[:, off + j:off + j + 1]
            off += d

        h1s_ref[:, pl.ds(col0, tile_n)] = h1.astype(h1s_ref.dtype)  # bf16 stash
        accum_stats(h1, 0)

        @pl.when(is_last)
        def _():
            finalize_stats(0, g1_col, bt1_col, 2)

    @pl.when(p == 1)
    def _phase1():
        h1 = h1s_ref[:, pl.ds(col0, tile_n)].astype(jnp.float32)
        a1 = jnp.maximum(h1 * st_ref[:, 2:3] + st_ref[:, 3:4], 0.0)   # BN + ReLU
        h2 = jnp.dot(w2_ref[...], a1.astype(MXU_DTYPE),
                     preferred_element_type=jnp.float32)              # b2 dropped
        h2s_ref[:, pl.ds(col0, tile_n)] = h2.astype(h2s_ref.dtype)
        accum_stats(h2, 4)

        @pl.when(is_last)
        def _():
            finalize_stats(4, g2_col, bt2_col, 6)

    @pl.when(p == 2)
    def _phase2():
        h2 = h2s_ref[:, pl.ds(col0, tile_n)].astype(jnp.float32)
        a2 = jnp.maximum(h2 * st_ref[:, 6:7] + st_ref[:, 7:8], 0.0)   # BN + ReLU
        h3 = jnp.dot(w3_ref[...], a2.astype(MXU_DTYPE),
                     preferred_element_type=jnp.float32)        # (out_total, tile_n)
        h3 = h3 + aux[:out_total, b3_col:b3_col + 1]
        # DistributionTransformer.after_forward ('normal', 'sample'):
        #   mu = rows [:outc]; std = softplus(rows [outc:]) + EPS
        out_ref[0:outc, :] = h3[0:outc, :]
        out_ref[outc:out_total, :] = _softplus(h3[outc:out_total, :]) + EPS


@functools.partial(jax.jit, static_argnames=("dcov_dims", "outc", "hidden"))
def distribution_mlp_forward(x, continue_covs, discrete_covs, params, *,
                             dcov_dims, outc, hidden=32):
    """Returns (mu, std) — the parameters of the Normal distribution the torch
    module would build.  x: (N, inc) f32; continue_covs: list of (N, d) f32;
    discrete_covs: list of (N,) int."""
    n, inc = x.shape
    out_total = 2 * outc
    assert out_total <= hidden and hidden % 16 == 0
    assert len(continue_covs) >= 1 and len(discrete_covs) == len(dcov_dims)

    cc = (continue_covs[0] if len(continue_covs) == 1
          else jnp.concatenate(continue_covs, axis=-1))
    ccw = cc.shape[1]
    sum_d = sum(dcov_dims)
    dc = jnp.stack([d.astype(jnp.int32) for d in discrete_covs], axis=-1)

    # ---- feature-major layout: batch on the 128-lane axis -------------------
    xT, ccT, dcT = x.T, cc.T, dc.T              # (inc,N), (ccw,N), (n_dcov,N)

    # big lane tiles amortize the ~0.35us per-grid-step overhead; lane dim of a
    # block must be a multiple of 128 (or the full extent).
    tile_n = min(2048, _round_up(n, 128))
    n_pad = _round_up(n, tile_n)
    nt = n_pad // tile_n
    need_mask = n_pad != n
    if need_mask:
        pad = n_pad - n
        xT = jnp.pad(xT, ((0, 0), (0, pad)))
        ccT = jnp.pad(ccT, ((0, 0), (0, pad)))
        dcT = jnp.pad(dcT, ((0, 0), (0, pad)))

    # ---- weights (MXU operands bf16, VPU/BN math f32) ------------------------
    w1 = params["w1"]                                  # (inc+ccw+sum_d, hidden)
    w1xT = w1[:inc].T.astype(MXU_DTYPE)                # (hidden, inc)    MXU
    w2T = params["w2"].T.astype(MXU_DTYPE)             # (hidden, hidden) MXU
    w3T = params["w3"].T.astype(MXU_DTYPE)             # (out_total, hidden) MXU

    # one packed f32 aux input: [W1c^T | W1d^T | g1 | bt1 | g2 | bt2 | b3]
    b3col = jnp.zeros((hidden, 1), jnp.float32).at[:out_total, 0].set(
        params["b3"].reshape(-1))
    aux = jnp.concatenate(
        [w1[inc:inc + ccw].T, w1[inc + ccw:].T,
         params["g1"].T, params["bt1"].T, params["g2"].T, params["bt2"].T,
         b3col], axis=1).astype(jnp.float32)           # (hidden, ccw+sum_d+5)
    naux = ccw + sum_d + 5

    kernel = functools.partial(
        _mlp_kernel, n_rows=n, tile_n=tile_n, need_mask=need_mask,
        ccw=ccw, dcov_dims=tuple(dcov_dims), outc=outc)

    # inputs stream during phase 0 only; park the block index on the last
    # fetched block during phases 1/2 so no redundant DMA fires at boundaries.
    x_map = lambda p, t: (0, jnp.where(p == 0, t, nt - 1))
    o_map = lambda p, t: (0, jnp.where(p == 2, t, 0))
    w_map = lambda p, t: (0, 0)

    # ---- VMEM budget with real (sublane, 128-lane) tile padding --------------
    def padded_bytes(shape, dtype):
        it = jnp.dtype(dtype).itemsize
        sub = {4: 8, 2: 16, 1: 32}[it]
        lead = 1
        for d in shape[:-2]:
            lead *= d
        return lead * _round_up(shape[-2], sub) * _round_up(shape[-1], 128) * it

    est = (2 * padded_bytes((hidden, n_pad), jnp.bfloat16)           # stashes
           + padded_bytes((hidden, 8), jnp.float32)                  # BN stats
           + 2 * (padded_bytes((inc, tile_n), jnp.float32)           # dbl-buffered
                  + padded_bytes((ccw, tile_n), jnp.float32)         #  streamed blks
                  + padded_bytes((dc.shape[1], tile_n), jnp.int32)
                  + padded_bytes((out_total, tile_n), jnp.float32))
           + 2 * (padded_bytes(w1xT.shape, MXU_DTYPE)                # resident wts
                  + padded_bytes(w2T.shape, MXU_DTYPE)
                  + padded_bytes(w3T.shape, MXU_DTYPE)
                  + padded_bytes((hidden, naux), jnp.float32)))

    cap = int(_VMEM_PHYSICAL_BYTES * 0.85)   # generation-aware (64 MiB on v7x)
    # TODO(synk): recompute h1/h2 from streamed inputs (O(tile) VMEM) instead of
    # stashing once the bf16 stash no longer fits; and split the lane-tile range
    # across the two v7x TensorCores with partial BN sums combined via CMEM.
    assert est <= cap, (
        f"batch too large for the VMEM-resident activation stash "
        f"(need {est} B, cap {cap} B)")
    cp_kwargs = dict(dimension_semantics=("arbitrary", "arbitrary"))
    if est + est // 4 > 16 * 1024 * 1024:    # may exceed the default scoped limit
        cp_kwargs["vmem_limit_bytes"] = min(cap,
                                            max(est + est // 4, 32 * 1024 * 1024))

    out = pl.pallas_call(
        kernel,
        out_shape=jax.ShapeDtypeStruct((out_total, n_pad), jnp.float32),
        grid_spec=pltpu.PrefetchScalarGridSpec(
            num_scalar_prefetch=0,
            grid=(3, nt),                               # phases outer, tiles inner
            in_specs=[
                pl.BlockSpec((inc, tile_n), x_map),
                pl.BlockSpec((ccw, tile_n), x_map),
                pl.BlockSpec((dc.shape[1], tile_n), x_map),
                pl.BlockSpec(w1xT.shape, w_map),
                pl.BlockSpec(w2T.shape, w_map),
                pl.BlockSpec(w3T.shape, w_map),
                pl.BlockSpec((hidden, naux), w_map),
            ],
            out_specs=pl.BlockSpec((out_total, tile_n), o_map),
            scratch_shapes=[
                pltpu.VMEM((hidden, n_pad), jnp.bfloat16),   # pre-BN layer-1 acts
                pltpu.VMEM((hidden, n_pad), jnp.bfloat16),   # pre-BN layer-2 acts
                pltpu.VMEM((hidden, 8), jnp.float32),        # BN sums / scale,shift
            ],
        ),
        compiler_params=pltpu.CompilerParams(**cp_kwargs),
    )(xT, ccT, dcT, w1xT, w2T, w3T, aux)

    mu = out[:outc, :n].T                    # back to batch-major (N, outc)
    std = out[outc:, :n].T
    return mu, std


def init_params(key, inc_total, hiddens, out_total):
    """Deterministic init matching nn.Linear default U(-1/sqrt(fan_in), +bound)
    and nn.BatchNorm1d default (gamma=1, beta=0).  b1/b2 are generated for
    fidelity with the torch parameter set but never loaded by the kernel:
    training-mode BatchNorm's mean subtraction cancels them exactly."""
    params = {}
    dims = [inc_total] + list(hiddens) + [out_total]
    keys = jax.random.split(key, 2 * (len(dims) - 1))
    for li in range(len(dims) - 1):
        fan_in, fan_out = dims[li], dims[li + 1]
        bound = 1.0 / (fan_in ** 0.5)
        kw, kb = keys[2 * li], keys[2 * li + 1]
        params[f"w{li+1}"] = jax.random.uniform(
            kw, (fan_in, fan_out), jnp.float32, -bound, bound)
        params[f"b{li+1}"] = jax.random.uniform(
            kb, (1, fan_out), jnp.float32, -bound, bound)
        if li < len(hiddens):                       # hidden layers carry BN
            params[f"g{li+1}"] = jnp.ones((1, fan_out), jnp.float32)
            params[f"bt{li+1}"] = jnp.zeros((1, fan_out), jnp.float32)
    return params


if __name__ == "__main__":
    # Small shapes consistent with the module instantiation.
    N = 8
    INC = 16
    CCOV_DIMS = (3,)
    DCOV_DIMS = (4,)
    HIDDEN = 32
    OUTC = 8                       # net emits 2*OUTC = 16 ('normal' + 'sample')

    key = jax.random.PRNGKey(0)
    kx, kc, kd, kp = jax.random.split(key, 4)

    x = jax.random.normal(kx, (N, INC), jnp.float32)
    ccov = [jax.random.normal(kc, (N, CCOV_DIMS[0]), jnp.float32)]
    dcov = [jax.random.randint(kd, (N,), 0, DCOV_DIMS[0], jnp.int32)]

    params = init_params(kp, INC + sum(CCOV_DIMS) + sum(DCOV_DIMS),
                         [HIDDEN, HIDDEN], 2 * OUTC)

    mu, std = distribution_mlp_forward(x, ccov, dcov, params,
                                       dcov_dims=DCOV_DIMS, outc=OUTC,
                                       hidden=HIDDEN)
    jax.block_until_ready((mu, std))

    assert mu.shape == (N, OUTC) and std.shape == (N, OUTC)
    assert mu.dtype == jnp.float32 and std.dtype == jnp.float32
    assert bool(jnp.all(std > 0))          # softplus(.) + EPS must be positive
    assert bool(jnp.all(jnp.isfinite(mu))) and bool(jnp.all(jnp.isfinite(std)))
    print("KERNEL_OK")
</pallas_src>

<mosaic_0001>
module attributes {stable_mosaic.version = 11 : i64} {
  func.func @_mlp_kernel(%arg0: i32, %arg1: i32, %arg2: memref<16x128xf32, #tpu.memory_space<vmem>>, %arg3: memref<3x128xf32, #tpu.memory_space<vmem>>, %arg4: memref<1x128xi32, #tpu.memory_space<vmem>>, %arg5: memref<32x16xbf16, #tpu.memory_space<vmem>>, %arg6: memref<32x32xbf16, #tpu.memory_space<vmem>>, %arg7: memref<16x32xbf16, #tpu.memory_space<vmem>>, %arg8: memref<32x12xf32, #tpu.memory_space<vmem>>, %arg9: memref<16x128xf32, #tpu.memory_space<vmem>>, %arg10: memref<32x128xbf16, #tpu.memory_space<vmem>>, %arg11: memref<32x128xbf16, #tpu.memory_space<vmem>>, %arg12: memref<32x8xf32, #tpu.memory_space<vmem>>) attributes {dimension_semantics = [#tpu.dimension_semantics<arbitrary>, #tpu.dimension_semantics<arbitrary>], iteration_bounds = array<i64: 3, 1>, scalar_prefetch = 0 : i64, scratch_operands = 3 : i64, tpu.core_type = #tpu.core_type<tc>, window_params = [{transform_indices = @transform_0, window_bounds = array<i64: 16, 128>}, {transform_indices = @transform_1, window_bounds = array<i64: 3, 128>}, {transform_indices = @transform_2, window_bounds = array<i64: 1, 128>}, {pipeline_mode = #tpu.pipeline_mode<synchronous>, transform_indices = @transform_3, window_bounds = array<i64: 32, 16>}, {pipeline_mode = #tpu.pipeline_mode<synchronous>, transform_indices = @transform_4, window_bounds = array<i64: 32, 32>}, {pipeline_mode = #tpu.pipeline_mode<synchronous>, transform_indices = @transform_5, window_bounds = array<i64: 16, 32>}, {pipeline_mode = #tpu.pipeline_mode<synchronous>, transform_indices = @transform_6, window_bounds = array<i64: 32, 12>}, {transform_indices = @transform_7, window_bounds = array<i64: 16, 128>}]} {
    %c0_i32 = arith.constant 0 : i32
    %0 = arith.cmpi eq, %arg1, %c0_i32 : i32
    %c128_i32 = arith.constant 128 : i32
    %1 = arith.muli %arg1, %c128_i32 : i32
    %2 = tpu.assume_multiple %1, 128 : i32
    %c0 = arith.constant 0 : index
    %c0_0 = arith.constant 0 : index
    %3 = vector.load %arg8[%c0, %c0_0] : memref<32x12xf32, #tpu.memory_space<vmem>>, vector<32x12xf32>
    %c0_i32_1 = arith.constant 0 : i32
    %4 = arith.cmpi eq, %arg0, %c0_i32_1 : i32
    %5 = arith.extui %4 : i1 to i32
    %c0_i32_2 = arith.constant 0 : i32
    %6 = arith.cmpi ne, %5, %c0_i32_2 : i32
    scf.if %6 {
      %c0_i32_5 = arith.constant 0 : i32
      %13 = arith.cmpi eq, %arg1, %c0_i32_5 : i32
      %14 = arith.extui %13 : i1 to i32
      %c0_i32_6 = arith.constant 0 : i32
      %15 = arith.cmpi ne, %14, %c0_i32_6 : i32
      scf.if %15 {
        %cst_23 = arith.constant 0.000000e+00 : f32
        %86 = vector.broadcast %cst_23 : f32 to vector<32x8xf32>
        %c0_24 = arith.constant 0 : index
        %c0_25 = arith.constant 0 : index
        %87 = vector.load %arg12[%c0_24, %c0_25] : memref<32x8xf32, #tpu.memory_space<vmem>>, vector<32x8xf32>
        tpu.vector_store %arg12[%c0_24, %c0_25], %86 {strides = array<i32>} : memref<32x8xf32, #tpu.memory_space<vmem>>, vector<32x8xf32>,
      } else {
      }
      %c0_7 = arith.constant 0 : index
      %c0_8 = arith.constant 0 : index
      %16 = vector.load %arg5[%c0_7, %c0_8] : memref<32x16xbf16, #tpu.memory_space<vmem>>, vector<32x16xbf16>
      %c0_9 = arith.constant 0 : index
      %c0_10 = arith.constant 0 : index
      %17 = vector.load %arg2[%c0_9, %c0_10] : memref<16x128xf32, #tpu.memory_space<vmem>>, vector<16x128xf32>
      %18 = arith.truncf %17 : vector<16x128xf32> to vector<16x128xbf16>
      %cst = arith.constant dense<0.000000e+00> : vector<32x128xf32>
      %19 = tpu.matmul %16, %18, %cst {dimension_numbers = #tpu.dot_dimension_numbers<[1], [0], [0], [1], [0, 0, 1, 1], [], []>} : vector<32x16xbf16>, vector<16x128xbf16>, vector<32x128xf32> -> vector<32x128xf32>
      %c0_11 = arith.constant 0 : index
      %c0_12 = arith.constant 0 : index
      %20 = vector.load %arg3[%c0_11, %c0_12] : memref<3x128xf32, #tpu.memory_space<vmem>>, vector<3x128xf32>
      %21 = vector.extract_strided_slice %3 {offsets = [0, 0], sizes = [32, 1], strides = [1, 1]} : vector<32x12xf32> to vector<32x1xf32>
      %22 = vector.extract_strided_slice %20 {offsets = [0, 0], sizes = [1, 128], strides = [1, 1]} : vector<3x128xf32> to vector<1x128xf32>
      %23 = vector.broadcast %21 : vector<32x1xf32> to vector<32x128xf32>
      %24 = vector.broadcast %22 : vector<1x128xf32> to vector<32x128xf32>
      %25 = arith.mulf %23, %24 : vector<32x128xf32>
      %26 = arith.addf %19, %25 : vector<32x128xf32>
      %27 = vector.extract_strided_slice %3 {offsets = [0, 1], sizes = [32, 1], strides = [1, 1]} : vector<32x12xf32> to vector<32x1xf32>
      %28 = vector.extract_strided_slice %20 {offsets = [1, 0], sizes = [1, 128], strides = [1, 1]} : vector<3x128xf32> to vector<1x128xf32>
      %29 = vector.broadcast %27 : vector<32x1xf32> to vector<32x128xf32>
      %30 = vector.broadcast %28 : vector<1x128xf32> to vector<32x128xf32>
      %31 = arith.mulf %29, %30 : vector<32x128xf32>
      %32 = arith.addf %26, %31 : vector<32x128xf32>
      %33 = vector.extract_strided_slice %3 {offsets = [0, 2], sizes = [32, 1], strides = [1, 1]} : vector<32x12xf32> to vector<32x1xf32>
      %34 = vector.extract_strided_slice %20 {offsets = [2, 0], sizes = [1, 128], strides = [1, 1]} : vector<3x128xf32> to vector<1x128xf32>
      %35 = vector.broadcast %33 : vector<32x1xf32> to vector<32x128xf32>
      %36 = vector.broadcast %34 : vector<1x128xf32> to vector<32x128xf32>
      %37 = arith.mulf %35, %36 : vector<32x128xf32>
      %38 = arith.addf %32, %37 : vector<32x128xf32>
      %c0_13 = arith.constant 0 : index
      %c0_14 = arith.constant 0 : index
      %39 = vector.load %arg4[%c0_13, %c0_14] : memref<1x128xi32, #tpu.memory_space<vmem>>, vector<1x128xi32>
      %c0_i32_15 = arith.constant 0 : i32
      %40 = vector.broadcast %c0_i32_15 : i32 to vector<1x128xi32>
      %41 = arith.cmpi eq, %39, %40 : vector<1x128xi32>
      %42 = arith.extui %41 : vector<1x128xi1> to vector<1x128xi32>
      %43 = arith.sitofp %42 : vector<1x128xi32> to vector<1x128xf32>
      %44 = vector.extract_strided_slice %3 {offsets = [0, 3], sizes = [32, 1], strides = [1, 1]} : vector<32x12xf32> to vector<32x1xf32>
      %45 = vector.broadcast %43 : vector<1x128xf32> to vector<32x128xf32>
      %46 = vector.broadcast %44 : vector<32x1xf32> to vector<32x128xf32>
      %47 = arith.mulf %45, %46 : vector<32x128xf32>
      %48 = arith.addf %38, %47 : vector<32x128xf32>
      %c1_i32_16 = arith.constant 1 : i32
      %49 = vector.broadcast %c1_i32_16 : i32 to vector<1x128xi32>
      %50 = arith.cmpi eq, %39, %49 : vector<1x128xi32>
      %51 = arith.extui %50 : vector<1x128xi1> to vector<1x128xi32>
      %52 = arith.sitofp %51 : vector<1x128xi32> to vector<1x128xf32>
      %53 = vector.extract_strided_slice %3 {offsets = [0, 4], sizes = [32, 1], strides = [1, 1]} : vector<32x12xf32> to vector<32x1xf32>
      %54 = vector.broadcast %52 : vector<1x128xf32> to vector<32x128xf32>
      %55 = vector.broadcast %53 : vector<32x1xf32> to vector<32x128xf32>
      %56 = arith.mulf %54, %55 : vector<32x128xf32>
      %57 = arith.addf %48, %56 : vector<32x128xf32>
      %c2_i32_17 = arith.constant 2 : i32
      %58 = vector.broadcast %c2_i32_17 : i32 to vector<1x128xi32>
      %59 = arith.cmpi eq, %39, %58 : vector<1x128xi32>
      %60 = arith.extui %59 : vector<1x128xi1> to vector<1x128xi32>
      %61 = arith.sitofp %60 : vector<1x128xi32> to vector<1x128xf32>
      %62 = vector.extract_strided_slice %3 {offsets = [0, 5], sizes = [32, 1], strides = [1, 1]} : vector<32x12xf32> to vector<32x1xf32>
      %63 = vector.broadcast %61 : vector<1x128xf32> to vector<32x128xf32>
      %64 = vector.broadcast %62 : vector<32x1xf32> to vector<32x128xf32>
      %65 = arith.mulf %63, %64 : vector<32x128xf32>
      %66 = arith.addf %57, %65 : vector<32x128xf32>
      %c3_i32 = arith.constant 3 : i32
      %67 = vector.broadcast %c3_i32 : i32 to vector<1x128xi32>
      %68 = arith.cmpi eq, %39, %67 : vector<1x128xi32>
      %69 = arith.extui %68 : vector<1x128xi1> to vector<1x128xi32>
      %70 = arith.sitofp %69 : vector<1x128xi32> to vector<1x128xf32>
      %71 = vector.extract_strided_slice %3 {offsets = [0, 6], sizes = [32, 1], strides = [1, 1]} : vector<32x12xf32> to vector<32x1xf32>
      %72 = vector.broadcast %70 : vector<1x128xf32> to vector<32x128xf32>
      %73 = vector.broadcast %71 : vector<32x1xf32> to vector<32x128xf32>
      %74 = arith.mulf %72, %73 : vector<32x128xf32>
      %75 = arith.addf %66, %74 : vector<32x128xf32>
      %76 = arith.truncf %75 : vector<32x128xf32> to vector<32x128xbf16>
      %c0_18 = arith.constant 0 : index
      %77 = arith.index_cast %2 : i32 to index
      %78 = vector.load %arg10[%c0_18, %77] : memref<32x128xbf16, #tpu.memory_space<vmem>>, vector<32x128xbf16>
      tpu.vector_store %arg10[%c0_18, %77], %76 {strides = array<i32>} : memref<32x128xbf16, #tpu.memory_space<vmem>>, vector<32x128xbf16>,
      %c0_i32_19 = arith.constant 0 : i32
      %79 = arith.cmpi ne, %arg1, %c0_i32_19 : i32
      %80 = arith.extui %79 : i1 to i32
      %c0_i32_20 = arith.constant 0 : i32
      %81 = arith.cmpi ne, %80, %c0_i32_20 : i32
      scf.if %81 {
        %cst_23 = arith.constant dense<0.000000e+00> : vector<32xf32>
        %86 = vector.multi_reduction <add>, %75, %cst_23 [1] : vector<32x128xf32> to vector<32xf32>
        %87 = vector.shape_cast %86 : vector<32xf32> to vector<32x1xf32>
        %88 = arith.mulf %75, %75 : vector<32x128xf32>
        %cst_24 = arith.constant dense<0.000000e+00> : vector<32xf32>
        %89 = vector.multi_reduction <add>, %88, %cst_24 [1] : vector<32x128xf32> to vector<32xf32>
        %90 = vector.shape_cast %89 : vector<32xf32> to vector<32x1xf32>
        %c0_25 = arith.constant 0 : index
        %c0_26 = arith.constant 0 : index
        %91 = vector.load %arg12[%c0_25, %c0_26] : memref<32x8xf32, #tpu.memory_space<vmem>>, vector<32x2xf32>
        %92 = tpu.concatenate %87, %90 in 1 : vector<32x1xf32>, vector<32x1xf32> -> vector<32x2xf32>
        %93 = arith.addf %91, %92 : vector<32x2xf32>
        %c0_27 = arith.constant 0 : index
        %c0_28 = arith.constant 0 : index
        %94 = vector.load %arg12[%c0_27, %c0_28] : memref<32x8xf32, #tpu.memory_space<vmem>>, vector<32x2xf32>
        tpu.vector_store %arg12[%c0_27, %c0_28], %93 {strides = array<i32>} : memref<32x8xf32, #tpu.memory_space<vmem>>, vector<32x2xf32>,
      } else {
      }
      %82 = arith.extui %0 : i1 to i32
      %c0_i32_21 = arith.constant 0 : i32
      %83 = arith.cmpi ne, %82, %c0_i32_21 : i32
      scf.if %83 {
        %86 = tpu.iota {dimensions = array<i32: 1>} : vector<1x128xi32>
        %87 = vector.broadcast %2 : i32 to vector<1x128xi32>
        %88 = arith.addi %87, %86 : vector<1x128xi32>
        %c8_i32 = arith.constant 8 : i32
        %89 = vector.broadcast %c8_i32 : i32 to vector<1x128xi32>
        %90 = arith.cmpi slt, %88, %89 : vector<1x128xi32>
        %91 = arith.extui %90 : vector<1x128xi1> to vector<1x128xi32>
        %92 = arith.sitofp %91 : vector<1x128xi32> to vector<1x128xf32>
        %93 = vector.broadcast %92 : vector<1x128xf32> to vector<32x128xf32>
        %94 = arith.mulf %75, %93 : vector<32x128xf32>
        %cst_23 = arith.constant dense<0.000000e+00> : vector<32xf32>
        %95 = vector.multi_reduction <add>, %94, %cst_23 [1] : vector<32x128xf32> to vector<32xf32>
        %96 = vector.shape_cast %95 : vector<32xf32> to vector<32x1xf32>
        %97 = arith.mulf %94, %94 : vector<32x128xf32>
        %cst_24 = arith.constant dense<0.000000e+00> : vector<32xf32>
        %98 = vector.multi_reduction <add>, %97, %cst_24 [1] : vector<32x128xf32> to vector<32xf32>
        %99 = vector.shape_cast %98 : vector<32xf32> to vector<32x1xf32>
        %c0_25 = arith.constant 0 : index
        %c0_26 = arith.constant 0 : index
        %100 = vector.load %arg12[%c0_25, %c0_26] : memref<32x8xf32, #tpu.memory_space<vmem>>, vector<32x2xf32>
        %101 = tpu.concatenate %96, %99 in 1 : vector<32x1xf32>, vector<32x1xf32> -> vector<32x2xf32>
        %102 = arith.addf %100, %101 : vector<32x2xf32>
        %c0_27 = arith.constant 0 : index
        %c0_28 = arith.constant 0 : index
        %103 = vector.load %arg12[%c0_27, %c0_28] : memref<32x8xf32, #tpu.memory_space<vmem>>, vector<32x2xf32>
        tpu.vector_store %arg12[%c0_27, %c0_28], %102 {strides = array<i32>} : memref<32x8xf32, #tpu.memory_space<vmem>>, vector<32x2xf32>,
      } else {
      }
      %84 = arith.extui %0 : i1 to i32
      %c0_i32_22 = arith.constant 0 : i32
      %85 = arith.cmpi ne, %84, %c0_i32_22 : i32
      scf.if %85 {
        %c0_23 = arith.constant 0 : index
        %c0_24 = arith.constant 0 : index
        %86 = vector.load %arg12[%c0_23, %c0_24] : memref<32x8xf32, #tpu.memory_space<vmem>>, vector<32x1xf32>
        %cst_25 = arith.constant 1.250000e-01 : f32
        %87 = vector.broadcast %cst_25 : f32 to vector<32x1xf32>
        %88 = arith.mulf %86, %87 : vector<32x1xf32>
        %c0_26 = arith.constant 0 : index
        %c1 = arith.constant 1 : index
        %89 = vector.load %arg12[%c0_26, %c1] : memref<32x8xf32, #tpu.memory_space<vmem>>, vector<32x1xf32>
        %cst_27 = arith.constant 1.250000e-01 : f32
        %90 = vector.broadcast %cst_27 : f32 to vector<32x1xf32>
        %91 = arith.mulf %89, %90 : vector<32x1xf32>
        %92 = arith.mulf %88, %88 : vector<32x1xf32>
        %93 = arith.subf %91, %92 : vector<32x1xf32>
        %cst_28 = arith.constant 0.000000e+00 : f32
        %94 = vector.broadcast %cst_28 : f32 to vector<32x1xf32>
        %95 = arith.maximumf %93, %94 : vector<32x1xf32>
        %96 = vector.extract_strided_slice %3 {offsets = [0, 7], sizes = [32, 1], strides = [1, 1]} : vector<32x12xf32> to vector<32x1xf32>
        %cst_29 = arith.constant 9.99999974E-6 : f32
        %97 = vector.broadcast %cst_29 : f32 to vector<32x1xf32>
        %98 = arith.addf %95, %97 : vector<32x1xf32>
        %99 = math.rsqrt %98 : vector<32x1xf32>
        %100 = arith.mulf %96, %99 : vector<32x1xf32>
        %101 = vector.extract_strided_slice %3 {offsets = [0, 8], sizes = [32, 1], strides = [1, 1]} : vector<32x12xf32> to vector<32x1xf32>
        %102 = arith.mulf %88, %100 : vector<32x1xf32>
        %103 = arith.subf %101, %102 : vector<32x1xf32>
        %104 = tpu.concatenate %100, %103 in 1 : vector<32x1xf32>, vector<32x1xf32> -> vector<32x2xf32>
        %c0_30 = arith.constant 0 : index
        %c2 = arith.constant 2 : index
        %105 = vector.load %arg12[%c0_30, %c2] : memref<32x8xf32, #tpu.memory_space<vmem>>, vector<32x2xf32>
        tpu.vector_store %arg12[%c0_30, %c2], %104 {strides = array<i32>} : memref<32x8xf32, #tpu.memory_space<vmem>>, vector<32x2xf32>,
      } else {
      }
    } else {
    }
    %c1_i32 = arith.constant 1 : i32
    %7 = arith.cmpi eq, %arg0, %c1_i32 : i32
    %8 = arith.extui %7 : i1 to i32
    %c0_i32_3 = arith.constant 0 : i32
    %9 = arith.cmpi ne, %8, %c0_i32_3 : i32
    scf.if %9 {
      %c0_5 = arith.constant 0 : index
      %13 = arith.index_cast %2 : i32 to index
      %14 = vector.load %arg10[%c0_5, %13] : memref<32x128xbf16, #tpu.memory_space<vmem>>, vector<32x128xbf16>
      %15 = arith.extf %14 : vector<32x128xbf16> to vector<32x128xf32>
      %c0_6 = arith.constant 0 : index
      %c2 = arith.constant 2 : index
      %16 = vector.load %arg12[%c0_6, %c2] : memref<32x8xf32, #tpu.memory_space<vmem>>, vector<32x1xf32>
      %17 = vector.broadcast %16 : vector<32x1xf32> to vector<32x128xf32>
      %18 = arith.mulf %15, %17 : vector<32x128xf32>
      %c0_7 = arith.constant 0 : index
      %c3 = arith.constant 3 : index
      %19 = vector.load %arg12[%c0_7, %c3] : memref<32x8xf32, #tpu.memory_space<vmem>>, vector<32x1xf32>
      %20 = vector.broadcast %19 : vector<32x1xf32> to vector<32x128xf32>
      %21 = arith.addf %18, %20 : vector<32x128xf32>
      %cst = arith.constant 0.000000e+00 : f32
      %22 = vector.broadcast %cst : f32 to vector<32x128xf32>
      %23 = arith.maximumf %21, %22 : vector<32x128xf32>
      %c0_8 = arith.constant 0 : index
      %c0_9 = arith.constant 0 : index
      %24 = vector.load %arg6[%c0_8, %c0_9] : memref<32x32xbf16, #tpu.memory_space<vmem>>, vector<32x32xbf16>
      %25 = arith.truncf %23 : vector<32x128xf32> to vector<32x128xbf16>
      %cst_10 = arith.constant dense<0.000000e+00> : vector<32x128xf32>
      %26 = tpu.matmul %24, %25, %cst_10 {dimension_numbers = #tpu.dot_dimension_numbers<[1], [0], [0], [1], [0, 0, 1, 1], [], []>} : vector<32x32xbf16>, vector<32x128xbf16>, vector<32x128xf32> -> vector<32x128xf32>
      %27 = arith.truncf %26 : vector<32x128xf32> to vector<32x128xbf16>
      %c0_11 = arith.constant 0 : index
      %28 = arith.index_cast %2 : i32 to index
      %29 = vector.load %arg11[%c0_11, %28] : memref<32x128xbf16, #tpu.memory_space<vmem>>, vector<32x128xbf16>
      tpu.vector_store %arg11[%c0_11, %28], %27 {strides = array<i32>} : memref<32x128xbf16, #tpu.memory_space<vmem>>, vector<32x128xbf16>,
      %c0_i32_12 = arith.constant 0 : i32
      %30 = arith.cmpi ne, %arg1, %c0_i32_12 : i32
      %31 = arith.extui %30 : i1 to i32
      %c0_i32_13 = arith.constant 0 : i32
      %32 = arith.cmpi ne, %31, %c0_i32_13 : i32
      scf.if %32 {
        %cst_16 = arith.constant dense<0.000000e+00> : vector<32xf32>
        %37 = vector.multi_reduction <add>, %26, %cst_16 [1] : vector<32x128xf32> to vector<32xf32>
        %38 = vector.shape_cast %37 : vector<32xf32> to vector<32x1xf32>
        %39 = arith.mulf %26, %26 : vector<32x128xf32>
        %cst_17 = arith.constant dense<0.000000e+00> : vector<32xf32>
        %40 = vector.multi_reduction <add>, %39, %cst_17 [1] : vector<32x128xf32> to vector<32xf32>
        %41 = vector.shape_cast %40 : vector<32xf32> to vector<32x1xf32>
        %c0_18 = arith.constant 0 : index
        %c4 = arith.constant 4 : index
        %42 = vector.load %arg12[%c0_18, %c4] : memref<32x8xf32, #tpu.memory_space<vmem>>, vector<32x2xf32>
        %43 = tpu.concatenate %38, %41 in 1 : vector<32x1xf32>, vector<32x1xf32> -> vector<32x2xf32>
        %44 = arith.addf %42, %43 : vector<32x2xf32>
        %c0_19 = arith.constant 0 : index
        %c4_20 = arith.constant 4 : index
        %45 = vector.load %arg12[%c0_19, %c4_20] : memref<32x8xf32, #tpu.memory_space<vmem>>, vector<32x2xf32>
        tpu.vector_store %arg12[%c0_19, %c4_20], %44 {strides = array<i32>} : memref<32x8xf32, #tpu.memory_space<vmem>>, vector<32x2xf32>,
      } else {
      }
      %33 = arith.extui %0 : i1 to i32
      %c0_i32_14 = arith.constant 0 : i32
      %34 = arith.cmpi ne, %33, %c0_i32_14 : i32
      scf.if %34 {
        %37 = tpu.iota {dimensions = array<i32: 1>} : vector<1x128xi32>
        %38 = vector.broadcast %2 : i32 to vector<1x128xi32>
        %39 = arith.addi %38, %37 : vector<1x128xi32>
        %c8_i32 = arith.constant 8 : i32
        %40 = vector.broadcast %c8_i32 : i32 to vector<1x128xi32>
        %41 = arith.cmpi slt, %39, %40 : vector<1x128xi32>
        %42 = arith.extui %41 : vector<1x128xi1> to vector<1x128xi32>
        %43 = arith.sitofp %42 : vector<1x128xi32> to vector<1x128xf32>
        %44 = vector.broadcast %43 : vector<1x128xf32> to vector<32x128xf32>
        %45 = arith.mulf %26, %44 : vector<32x128xf32>
        %cst_16 = arith.constant dense<0.000000e+00> : vector<32xf32>
        %46 = vector.multi_reduction <add>, %45, %cst_16 [1] : vector<32x128xf32> to vector<32xf32>
        %47 = vector.shape_cast %46 : vector<32xf32> to vector<32x1xf32>
        %48 = arith.mulf %45, %45 : vector<32x128xf32>
        %cst_17 = arith.constant dense<0.000000e+00> : vector<32xf32>
        %49 = vector.multi_reduction <add>, %48, %cst_17 [1] : vector<32x128xf32> to vector<32xf32>
        %50 = vector.shape_cast %49 : vector<32xf32> to vector<32x1xf32>
        %c0_18 = arith.constant 0 : index
        %c4 = arith.constant 4 : index
        %51 = vector.load %arg12[%c0_18, %c4] : memref<32x8xf32, #tpu.memory_space<vmem>>, vector<32x2xf32>
        %52 = tpu.concatenate %47, %50 in 1 : vector<32x1xf32>, vector<32x1xf32> -> vector<32x2xf32>
        %53 = arith.addf %51, %52 : vector<32x2xf32>
        %c0_19 = arith.constant 0 : index
        %c4_20 = arith.constant 4 : index
        %54 = vector.load %arg12[%c0_19, %c4_20] : memref<32x8xf32, #tpu.memory_space<vmem>>, vector<32x2xf32>
        tpu.vector_store %arg12[%c0_19, %c4_20], %53 {strides = array<i32>} : memref<32x8xf32, #tpu.memory_space<vmem>>, vector<32x2xf32>,
      } else {
      }
      %35 = arith.extui %0 : i1 to i32
      %c0_i32_15 = arith.constant 0 : i32
      %36 = arith.cmpi ne, %35, %c0_i32_15 : i32
      scf.if %36 {
        %c0_16 = arith.constant 0 : index
        %c4 = arith.constant 4 : index
        %37 = vector.load %arg12[%c0_16, %c4] : memref<32x8xf32, #tpu.memory_space<vmem>>, vector<32x1xf32>
        %cst_17 = arith.constant 1.250000e-01 : f32
        %38 = vector.broadcast %cst_17 : f32 to vector<32x1xf32>
        %39 = arith.mulf %37, %38 : vector<32x1xf32>
        %c0_18 = arith.constant 0 : index
        %c5 = arith.constant 5 : index
        %40 = vector.load %arg12[%c0_18, %c5] : memref<32x8xf32, #tpu.memory_space<vmem>>, vector<32x1xf32>
        %cst_19 = arith.constant 1.250000e-01 : f32
        %41 = vector.broadcast %cst_19 : f32 to vector<32x1xf32>
        %42 = arith.mulf %40, %41 : vector<32x1xf32>
        %43 = arith.mulf %39, %39 : vector<32x1xf32>
        %44 = arith.subf %42, %43 : vector<32x1xf32>
        %cst_20 = arith.constant 0.000000e+00 : f32
        %45 = vector.broadcast %cst_20 : f32 to vector<32x1xf32>
        %46 = arith.maximumf %44, %45 : vector<32x1xf32>
        %47 = vector.extract_strided_slice %3 {offsets = [0, 9], sizes = [32, 1], strides = [1, 1]} : vector<32x12xf32> to vector<32x1xf32>
        %cst_21 = arith.constant 9.99999974E-6 : f32
        %48 = vector.broadcast %cst_21 : f32 to vector<32x1xf32>
        %49 = arith.addf %46, %48 : vector<32x1xf32>
        %50 = math.rsqrt %49 : vector<32x1xf32>
        %51 = arith.mulf %47, %50 : vector<32x1xf32>
        %52 = vector.extract_strided_slice %3 {offsets = [0, 10], sizes = [32, 1], strides = [1, 1]} : vector<32x12xf32> to vector<32x1xf32>
        %53 = arith.mulf %39, %51 : vector<32x1xf32>
        %54 = arith.subf %52, %53 : vector<32x1xf32>
        %55 = tpu.concatenate %51, %54 in 1 : vector<32x1xf32>, vector<32x1xf32> -> vector<32x2xf32>
        %c0_22 = arith.constant 0 : index
        %c6 = arith.constant 6 : index
        %56 = vector.load %arg12[%c0_22, %c6] : memref<32x8xf32, #tpu.memory_space<vmem>>, vector<32x2xf32>
        tpu.vector_store %arg12[%c0_22, %c6], %55 {strides = array<i32>} : memref<32x8xf32, #tpu.memory_space<vmem>>, vector<32x2xf32>,
      } else {
      }
    } else {
    }
    %c2_i32 = arith.constant 2 : i32
    %10 = arith.cmpi eq, %arg0, %c2_i32 : i32
    %11 = arith.extui %10 : i1 to i32
    %c0_i32_4 = arith.constant 0 : i32
    %12 = arith.cmpi ne, %11, %c0_i32_4 : i32
    scf.if %12 {
      %c0_5 = arith.constant 0 : index
      %13 = arith.index_cast %2 : i32 to index
      %14 = vector.load %arg11[%c0_5, %13] : memref<32x128xbf16, #tpu.memory_space<vmem>>, vector<32x128xbf16>
      %15 = arith.extf %14 : vector<32x128xbf16> to vector<32x128xf32>
      %c0_6 = arith.constant 0 : index
      %c6 = arith.constant 6 : index
      %16 = vector.load %arg12[%c0_6, %c6] : memref<32x8xf32, #tpu.memory_space<vmem>>, vector<32x1xf32>
      %17 = vector.broadcast %16 : vector<32x1xf32> to vector<32x128xf32>
      %18 = arith.mulf %15, %17 : vector<32x128xf32>
      %c0_7 = arith.constant 0 : index
      %c7 = arith.constant 7 : index
      %19 = vector.load %arg12[%c0_7, %c7] : memref<32x8xf32, #tpu.memory_space<vmem>>, vector<32x1xf32>
      %20 = vector.broadcast %19 : vector<32x1xf32> to vector<32x128xf32>
      %21 = arith.addf %18, %20 : vector<32x128xf32>
      %cst = arith.constant 0.000000e+00 : f32
      %22 = vector.broadcast %cst : f32 to vector<32x128xf32>
      %23 = arith.maximumf %21, %22 : vector<32x128xf32>
      %c0_8 = arith.constant 0 : index
      %c0_9 = arith.constant 0 : index
      %24 = vector.load %arg7[%c0_8, %c0_9] : memref<16x32xbf16, #tpu.memory_space<vmem>>, vector<16x32xbf16>
      %25 = arith.truncf %23 : vector<32x128xf32> to vector<32x128xbf16>
      %cst_10 = arith.constant dense<0.000000e+00> : vector<16x128xf32>
      %26 = tpu.matmul %24, %25, %cst_10 {dimension_numbers = #tpu.dot_dimension_numbers<[1], [0], [0], [1], [0, 0, 1, 1], [], []>} : vector<16x32xbf16>, vector<32x128xbf16>, vector<16x128xf32> -> vector<16x128xf32>
      %27 = vector.extract_strided_slice %3 {offsets = [0, 11], sizes = [16, 1], strides = [1, 1]} : vector<32x12xf32> to vector<16x1xf32>
      %28 = vector.broadcast %27 : vector<16x1xf32> to vector<16x128xf32>
      %29 = arith.addf %26, %28 : vector<16x128xf32>
      %30 = vector.extract_strided_slice %29 {offsets = [0, 0], sizes = [8, 128], strides = [1, 1]} : vector<16x128xf32> to vector<8x128xf32>
      %c0_11 = arith.constant 0 : index
      %c0_12 = arith.constant 0 : index
      %31 = vector.load %arg9[%c0_11, %c0_12] : memref<16x128xf32, #tpu.memory_space<vmem>>, vector<8x128xf32>
      tpu.vector_store %arg9[%c0_11, %c0_12], %30 {strides = array<i32>} : memref<16x128xf32, #tpu.memory_space<vmem>>, vector<8x128xf32>,
      %32 = vector.extract_strided_slice %29 {offsets = [8, 0], sizes = [8, 128], strides = [1, 1]} : vector<16x128xf32> to vector<8x128xf32>
      %cst_13 = arith.constant 0.000000e+00 : f32
      %33 = vector.broadcast %cst_13 : f32 to vector<8x128xf32>
      %34 = arith.maximumf %32, %33 : vector<8x128xf32>
      %35 = math.absf %32 : vector<8x128xf32>
      %cst_14 = arith.constant 0.000000e+00 : f32
      %36 = vector.broadcast %cst_14 : f32 to vector<8x128xf32>
      %37 = arith.subf %36, %35 : vector<8x128xf32>
      %38 = math.exp %37 : vector<8x128xf32>
      %cst_15 = arith.constant 1.000000e+00 : f32
      %39 = vector.broadcast %cst_15 : f32 to vector<8x128xf32>
      %40 = arith.addf %39, %38 : vector<8x128xf32>
      %41 = math.log %40 : vector<8x128xf32>
      %42 = arith.addf %34, %41 : vector<8x128xf32>
      %cst_16 = arith.constant 9.99999993E-9 : f32
      %43 = vector.broadcast %cst_16 : f32 to vector<8x128xf32>
      %44 = arith.addf %42, %43 : vector<8x128xf32>
      %c8 = arith.constant 8 : index
      %c0_17 = arith.constant 0 : index
      %45 = vector.load %arg9[%c8, %c0_17] : memref<16x128xf32, #tpu.memory_space<vmem>>, vector<8x128xf32>
      tpu.vector_store %arg9[%c8, %c0_17], %44 {strides = array<i32>} : memref<16x128xf32, #tpu.memory_space<vmem>>, vector<8x128xf32>,
    } else {
    }
    return
  }
  func.func @transform_0(%arg0: i32, %arg1: i32) -> (i32, i32) {
    %c0_i32 = arith.constant 0 : i32
    %0 = arith.cmpi eq, %arg0, %c0_i32 : i32
    %c0_i32_0 = arith.constant 0 : i32
    %1 = arith.select %0, %arg1, %c0_i32_0 : i32
    %c0_i32_1 = arith.constant 0 : i32
    %c0_i32_2 = arith.constant 0 : i32
    return %c0_i32_1, %1 : i32, i32
  }
  func.func @transform_1(%arg0: i32, %arg1: i32) -> (i32, i32) {
    %c0_i32 = arith.constant 0 : i32
    %0 = arith.cmpi eq, %arg0, %c0_i32 : i32
    %c0_i32_0 = arith.constant 0 : i32
    %1 = arith.select %0, %arg1, %c0_i32_0 : i32
    %c0_i32_1 = arith.constant 0 : i32
    %c0_i32_2 = arith.constant 0 : i32
    return %c0_i32_1, %1 : i32, i32
  }
  func.func @transform_2(%arg0: i32, %arg1: i32) -> (i32, i32) {
    %c0_i32 = arith.constant 0 : i32
    %0 = arith.cmpi eq, %arg0, %c0_i32 : i32
    %c0_i32_0 = arith.constant 0 : i32
    %1 = arith.select %0, %arg1, %c0_i32_0 : i32
    %c0_i32_1 = arith.constant 0 : i32
    %c0_i32_2 = arith.constant 0 : i32
    return %c0_i32_1, %1 : i32, i32
  }
  func.func @transform_3(%arg0: i32, %arg1: i32) -> (i32, i32) {
    %c0_i32 = arith.constant 0 : i32
    %c0_i32_0 = arith.constant 0 : i32
    %c0_i32_1 = arith.constant 0 : i32
    return %c0_i32, %c0_i32_0 : i32, i32
  }
  func.func @transform_4(%arg0: i32, %arg1: i32) -> (i32, i32) {
    %c0_i32 = arith.constant 0 : i32
    %c0_i32_0 = arith.constant 0 : i32
    %c0_i32_1 = arith.constant 0 : i32
    return %c0_i32, %c0_i32_0 : i32, i32
  }
  func.func @transform_5(%arg0: i32, %arg1: i32) -> (i32, i32) {
    %c0_i32 = arith.constant 0 : i32
    %c0_i32_0 = arith.constant 0 : i32
    %c0_i32_1 = arith.constant 0 : i32
    return %c0_i32, %c0_i32_0 : i32, i32
  }
  func.func @transform_6(%arg0: i32, %arg1: i32) -> (i32, i32) {
    %c0_i32 = arith.constant 0 : i32
    %c0_i32_0 = arith.constant 0 : i32
    %c0_i32_1 = arith.constant 0 : i32
    return %c0_i32, %c0_i32_0 : i32, i32
  }
  func.func @transform_7(%arg0: i32, %arg1: i32) -> (i32, i32) {
    %c2_i32 = arith.constant 2 : i32
    %0 = arith.cmpi eq, %arg0, %c2_i32 : i32
    %c0_i32 = arith.constant 0 : i32
    %1 = arith.select %0, %arg1, %c0_i32 : i32
    %c0_i32_0 = arith.constant 0 : i32
    %c0_i32_1 = arith.constant 0 : i32
    return %c0_i32_0, %1 : i32, i32
  }
}

</mosaic_0001>

<bundles_post_ra>
// kernel: distribution_mlp_forward.1
= control target key start
LH: loop header
LB: loop body
LE: loop exit
PB: predicated region body
PF: predicated region fallthrough
CT: control target
= control target key end

     0   :  { %s1848_s24 = smov 0   ;;  %s1850_s25 = smov 0   ;;  %s2156_s0 = inlined_call_operand.vmem [shape: f32[16,128], index: 0, kind: input, shape index: {}]   ;;  %s2157_s1 = inlined_call_operand.vmem [shape: f32[3,128], index: 1, kind: input, shape index: {}]   ;;  %s2158_s2 = inlined_call_operand.vmem [shape: s32[1,128], index: 2, kind: input, shape index: {}]   ;;  %s2159_s3 = inlined_call_operand.vmem [shape: bf16[32,16], index: 3, kind: input, shape index: {}]   ;;  %s2160_s4 = inlined_call_operand.vmem [shape: bf16[32,32], index: 4, kind: input, shape index: {}]   ;;  %s2161_s5 = inlined_call_operand.vmem [shape: bf16[16,32], index: 5, kind: input, shape index: {}]   ;;  %s2162_s6 = inlined_call_operand.vmem [shape: f32[32,12], index: 6, kind: input, shape index: {}]   ;;  %s2163_s7 = inlined_call_operand.vmem [shape: f32[16,128], index: 7, kind: output, shape index: {}]  }
   0x1   :  { %s1852_s26 = smov 0  }
   0x2 LB: > { %s29_s27 = sadd.s32 1, %s1778_s25  ;;  %p1575_p0 = scmp.ge.s32.totalorder %s1782_s26, 1  ;;  %s1782_s26 = sphi %s1852_s26, %s17_s26   ;;  %s1778_s25 = sphi %s1850_s25, %s2165_s25   ;;  %s1774_s24 = sphi %s1848_s24, %s2164_s24  }
   0x3   : > { %p31_p1 = scmp.ge.s32.totalorder %s29_s27, 3  ;;  %p293_p2 = scmp.lt.s32.totalorder %s1782_s26, 4 }
   0x5   : > { %s2167_s27 = smov (%p31_p1, %s29_s27), 0  ;;  %p294_p3 = pnand %p1575_p0, %p293_p2 }
   0x6   : > { %p1576_p4 = scmp.ne.s32.totalorder (!%p294_p3), %s1774_s24, 0 }
   0x7   : > { %297 = sbr.rel (%p294_p3) target bundleno = 2632 (0xa48), region = 48 }
   0xc   : > { %v1871_v0 = vld [vmem:[%s2162_s6] sm:$0xff]  ;;  %v1876_v1 = vld [vmem:[%s2162_s6 + $0x8] sm:$0xff]  ;;  %v1881_v2 = vld [vmem:[%s2162_s6 + $0x10] sm:$0xff]  ;;  %379 = sbr.rel (%p1576_p4) target bundleno = 1071 (0x42f), region = 52  ;;  %s1792_s29 = smov (!%p1576_p4), 1  }
   0xd   : > { %v1886_v3 = vld [vmem:[%s2162_s6 + $0x18] sm:$0xff]  ;;  %s1793_s30 = smov (!%p1576_p4), 6   ;;  %s1794_s8 = smov (!%p1576_p4), 121  }
   0xe   : > { %s1795_s9 = smov (!%p1576_p4), 8   ;;  %s1796_s10 = smov (!%p1576_p4), 2  }
  0x11   : > { %v392_v4 = vld [vmem:[%s2156_s0] sm:$0xff]  ;;  %v393_v5 = vld [vmem:[%s2156_s0 + $0x8] sm:$0xff]  ;;  %v1784_v6 = vmov 0   ;;  %vm431_vm0 = vcmask 130048   ;;  %v1785_v10 = vmov 1   ;;  %v1786_v11 = vmov 2  }
  0x12   : > { %1711 = vset.pattern.permute.xlu1 %v1784_v6  ;;  %1710 = vset.pattern.permute.xlu0 %v1784_v6  ;;  %v394_v7 = vpack.c.bf16 %v393_v5, %v392_v4  ;;  %v1614_v8 = vld [vmem:[%s2159_s3] sm:$0xff]  ;;  %v1615_v9 = vld [vmem:[%s2159_s3 + $0x8] sm:$0xff]  ;;  %v1787_v12 = vmov 3   ;;  %v1788_v13 = vmov 4   ;;  %v1789_v14 = vmov 5  }
  0x13   : > { %408 = vperm.xlu1 %1711, %v1881_v2   ;;  %398 = vperm.xlu0 %1710, %v1871_v0   ;;  %v1790_v15 = vmov 6   ;;  %v395_v22 = vld [vmem:[%s2157_s1] sm:$0x7]  ;;  %v1791_v47 = vmov 0.0   ;;  %v685_v57 = vlaneseq  ;;  %vm383_vm6 = vcmask 64512  }
  0x14   : > { %445 = vmatpush.bf16.msra.mxu0 %v394_v7  ;;  %1659 = vmatpush.bf16.msra.mxu1 %v394_v7  ;;  %v1936_v24 = vperm.slane %v395_v22, 1  ;;  %v1938_v25 = vperm.slane %v395_v22, 0  ;;  %v1940_v26 = vperm.slane %v395_v22, 2  ;;  %v507_v42 = vld [vmem:[%s2158_s2] sm:$0x1]  ;;  %385 = vst.msk [vmem:[#allocation4 + $0x8] sm:$0xff] %vm383_vm6, %v1791_v47 }
  0x15   : > { %1712 = vset.pattern.permute.xlu2 %v1785_v10  ;;  %vm508_vm1 = vcmp.eq.s32.totalorder %v507_v42, 0  ;;  %vm538_vm2 = vcmp.eq.s32.totalorder %v507_v42, 1  ;;  %vm568_vm3 = vcmp.eq.s32.totalorder %v507_v42, 2  ;;  %vm598_vm4 = vcmp.eq.s32.totalorder %v507_v42, 3  ;;  %384 = vst.msk [vmem:[#allocation4] sm:$0xff] %vm383_vm6, %v1791_v47 }
  0x16   : > { %458 = vperm.xlu2 %1712, %v1871_v0   ;;  %v1587_v48 = vsel %vm508_vm1, 1.0, %v1791_v47  ;;  %v1588_v58 = vsel %vm538_vm2, 1.0, %v1791_v47  ;;  %v1589_v59 = vsel %vm568_vm3, 1.0, %v1791_v47  ;;  %v1590_v63 = vsel %vm598_vm4, 1.0, %v1791_v47  ;;  %386 = vst.msk [vmem:[#allocation4 + $0x10] sm:$0xff] %vm383_vm6, %v1791_v47 }
  0x17   : > { %1585 = vmatmul.msk.bf16.vlgmr.msra.gmra.mxu0 %vm431_vm0, %v1614_v8  ;;  %1586 = vmatmul.msk.bf16.vlgmr.msra.gmra.mxu1 %vm431_vm0, %v1615_v9  ;;  %v1961_v53 = vperm.slane %v1587_v48, 0  ;;  %v542_v4 = vperm.slane %v1588_v58, 0  ;;  %v572_v5 = vperm.slane %v1589_v59, 0  ;;  %v686_v6 = vand.u32 127, %v685_v57  ;;  %387 = vst.msk [vmem:[#allocation4 + $0x18] sm:$0xff] %vm383_vm6, %v1791_v47 }
  0x18   : > { %vm720_vm7 = vcmask 7168   ;;  %vm729_vm8 = vcmask 15360  }
  0x19   : > { %vm689_vm5 = vcmp.lt.s32.totalorder %v686_v6, 8 }
  0x1a   : > { %v1591_v22 = vsel %vm689_vm5, 1.0, %v1791_v47  ;;  %vm910_vm5 = vcmask 31760  }
  0x1b   : > { %413 = vperm.xlu1 %1711, %v1886_v3   ;;  %403 = vperm.xlu0 %1710, %v1876_v1  }
  0x1c   : > { %v716_v47 = vld [vmem:[#allocation4] sm:$0xff] }
  0x1e   : > { %462 = vperm.xlu2 %1712, %v1876_v1  }
  0x23   : > { %1714 = vset.pattern.permute.xlu1 %v1785_v10  ;;  %1713 = vset.pattern.permute.xlu0 %v1785_v10 }
  0x24   : > { %470 = vperm.xlu1 %1714, %v1886_v3   ;;  %466 = vperm.xlu0 %1713, %v1881_v2  }
  0x26   : > { %1715 = vset.pattern.permute.xlu2 %v1786_v11 }
  0x27   : > { %483 = vperm.xlu2 %1715, %v1871_v0  }
  0x2c   : > { %1716 = vset.pattern.permute.xlu1 %v1786_v11  ;;  %1717 = vset.pattern.permute.xlu0 %v1786_v11  ;;  %v602_v11 = vperm.slane %v1590_v63, 0 }
  0x2d   : > { %487 = vperm.xlu1 %1716, %v1876_v1   ;;  %495 = vperm.xlu0 %1717, %v1886_v3  }
  0x2f   : > { %491 = vperm.xlu2 %1715, %v1881_v2  }
  0x35   : > { %1718 = vset.pattern.permute.xlu1 %v1787_v12  ;;  %1720 = vset.pattern.permute.xlu0 %v1788_v13 }
  0x36   : > { %515 = vperm.xlu1 %1718, %v1871_v0   ;;  %545 = vperm.xlu0 %1720, %v1871_v0  }
  0x37   : > { %1719 = vset.pattern.permute.xlu2 %v1787_v12 }
  0x38   : > { %519 = vperm.xlu2 %1719, %v1876_v1  }
  0x3e   : > { %523 = vperm.xlu1 %1718, %v1881_v2   ;;  %1724 = vset.pattern.permute.xlu0 %v1789_v14 }
  0x3f   : > { %579 = vperm.xlu0 %1724, %v1876_v1  }
  0x40   : > { %527 = vperm.xlu2 %1719, %v1886_v3  }
  0x46   : > { %1721 = vset.pattern.permute.xlu1 %v1788_v13 }
  0x47   : > { %549 = vperm.xlu1 %1721, %v1876_v1   ;;  %1728 = vset.pattern.permute.xlu0 %v1790_v15 }
  0x48   : > { %1722 = vset.pattern.permute.xlu2 %v1788_v13  ;;  %613 = vperm.xlu0 %1728, %v1881_v2  }
  0x49   : > { %553 = vperm.xlu2 %1722, %v1881_v2  }
  0x4f   : > { %557 = vperm.xlu1 %1721, %v1886_v3  }
  0x51   : > { %1723 = vset.pattern.permute.xlu2 %v1789_v14 }
  0x52   : > { %575 = vperm.xlu2 %1723, %v1871_v0  }
  0x57   : > { %1725 = vset.pattern.permute.xlu1 %v1789_v14 }
  0x58   : > { %583 = vperm.xlu1 %1725, %v1881_v2  }
  0x5a   : > { %587 = vperm.xlu2 %1723, %v1886_v3  }
  0x60   : > { %1726 = vset.pattern.permute.xlu1 %v1790_v15 }
  0x61   : > { %605 = vperm.xlu1 %1726, %v1871_v0  }
  0x62   : > { %1727 = vset.pattern.permute.xlu2 %v1790_v15 }
  0x63   : > { %609 = vperm.xlu2 %1727, %v1876_v1  }
  0x69   : > { %617 = vperm.xlu1 %1726, %v1886_v3  }
  0x70   : > { %v459_v16 = vpop.permute.xlu2 %458 }
  0x71   : > { %v474_v29 = vmul.f32 %v1936_v24, %v459_v16 }
  0x78   : > { %v463_v17 = vpop.permute.xlu2 %462 }
  0x79   : > { %v475_v51 = vmul.f32 %v1936_v24, %v463_v17 }
  0x81   : > { %v484_v18 = vpop.permute.xlu2 %483 }
  0x82   : > { %v499_v32 = vmul.f32 %v1940_v26, %v484_v18 }
  0x85   : > { %v409_v19 = vpop.permute.xlu1 %408  ;;  %v399_v20 = vpop.permute.xlu0 %398 }
  0x86   : > { %v417_v27 = vmul.f32 %v1938_v25, %v399_v20  ;;  %v419_v14 = vmul.f32 %v1938_v25, %v409_v19 }
  0x89   : > { %v1929_v21 = vpop.permute.xlu2 %491 }
  0x8d   : > { %v1934_v23 = vpop.permute.xlu1 %413  ;;  %v404_v30 = vpop.permute.xlu0 %403 }
  0x8e   : > { %v418_v44 = vmul.f32 %v1938_v25, %v404_v30 }
  0x92   : > { %v520_v28 = vpop.permute.xlu2 %519 }
  0x93   : > { %v531_v60 = vmul.f32 %v520_v28, %v1961_v53  ;;  %v501_v28 = vmul.f32 %v1940_v26, %v1929_v21 }
  0x94   : > { %v447_v31 = vpop.f32.mrf.mxu0  ;;  %v452_v12 = vpop.f32.mrf.mxu1 }
  0x95   : > { %v448_v33 = vadd.f32 %v447_v31, %v417_v27  ;;  %v453_v20 = vadd.f32 %v452_v12, %v419_v14 }
  0x96   : > { %v1945_v34 = vpop.permute.xlu1 %470  ;;  %v467_v38 = vpop.permute.xlu0 %466 }
  0x97   : > { %v478_v35 = vadd.f32 %v474_v29, %v448_v33  ;;  %v476_v15 = vmul.f32 %v1936_v24, %v467_v38 }
  0x99   : > { %v1947_v36 = vadd.f32 %v499_v32, %v478_v35  ;;  %v480_v29 = vadd.f32 %v476_v15, %v453_v20 }
  0x9a   : > { %v1949_v37 = vpop.permute.xlu2 %527 }
  0x9b   : > { %v505_v33 = vadd.f32 %v501_v28, %v480_v29 }
  0x9c   : > { %v449_v45 = vpop.f32.mrf.mxu0  ;;  %v454_v19 = vpop.f32.mrf.mxu1 }
  0x9d   : > { %v450_v49 = vadd.f32 %v449_v45, %v418_v44 }
  0x9f   : > { %v488_v39 = vpop.permute.xlu1 %487  ;;  %v1951_v41 = vpop.permute.xlu0 %495  ;;  %v479_v54 = vadd.f32 %v475_v51, %v450_v49 }
  0xa0   : > { %v500_v55 = vmul.f32 %v1940_v26, %v488_v39  ;;  %v420_v39 = vmul.f32 %v1938_v25, %v1934_v23  ;;  %v502_v23 = vmul.f32 %v1940_v26, %v1951_v41 }
  0xa2   : > { %v504_v61 = vadd.f32 %v500_v55, %v479_v54  ;;  %v455_v45 = vadd.f32 %v454_v19, %v420_v39 }
  0xa3   : > { %v554_v40 = vpop.permute.xlu2 %553 }
  0xa4   : > { %v535_v8 = vadd.f32 %v531_v60, %v504_v61  ;;  %v562_v35 = vmul.f32 %v554_v40, %v542_v4  ;;  %v533_v61 = vmul.f32 %v1949_v37, %v1961_v53 }
  0xa8   : > { %v516_v43 = vpop.permute.xlu1 %515  ;;  %v546_v50 = vpop.permute.xlu0 %545 }
  0xa9   : > { %v530_v42 = vmul.f32 %v516_v43, %v1961_v53  ;;  %v560_v57 = vmul.f32 %v546_v50, %v542_v4 }
  0xab   : > { %v534_v55 = vadd.f32 %v530_v42, %v1947_v36 }
  0xac   : > { %v1957_v46 = vpop.permute.xlu2 %575 }
  0xad   : > { %v564_v43 = vadd.f32 %v560_v57, %v534_v55  ;;  %v590_v59 = vmul.f32 %v1957_v46, %v572_v5 }
  0xb0   : > { %v524_v52 = vpop.permute.xlu1 %523 }
  0xb1   : > { %v580_v62 = vpop.permute.xlu0 %579  ;;  %v532_v32 = vmul.f32 %v524_v52, %v1961_v53  ;;  %v477_v52 = vmul.f32 %v1936_v24, %v1945_v34  ;;  %v594_v24 = vadd.f32 %v590_v59, %v564_v43 }
  0xb2   : > { %v591_v10 = vmul.f32 %v580_v62, %v572_v5 }
  0xb3   : > { %v536_v38 = vadd.f32 %v532_v32, %v505_v33  ;;  %v481_v58 = vadd.f32 %v477_v52, %v455_v45 }
  0xb4   : > { %v1964_v56 = vpop.permute.xlu2 %587 }
  0xb5   : > { %v566_v21 = vadd.f32 %v562_v35, %v536_v38  ;;  %v506_v62 = vadd.f32 %v502_v23, %v481_v58 }
  0xb7   : > { %v537_v50 = vadd.f32 %v533_v61, %v506_v62 }
  0xb9   : > { %v550_v7 = vpop.permute.xlu1 %549 }
  0xba   : > { %v561_v9 = vmul.f32 %v550_v7, %v542_v4  ;;  %v614_v44 = vpop.permute.xlu0 %613  ;;  %v593_v7 = vmul.f32 %v1964_v56, %v572_v5 }
  0xbb   : > { %v622_v54 = vmul.f32 %v614_v44, %v602_v11  ;;  %v718_v44 = vld [vmem:[#allocation4 + $0x10] sm:$0xff] }
  0xbc   : > { %v565_v13 = vadd.f32 %v561_v9, %v535_v8 }
  0xbd   : > { %v610_v16 = vpop.permute.xlu2 %609 }
  0xbe   : > { %v595_v17 = vadd.f32 %v591_v10, %v565_v13  ;;  %v621_v18 = vmul.f32 %v610_v16, %v602_v11 }
  0xc0   : > { %v625_v27 = vadd.f32 %v621_v18, %v595_v17 }
  0xc1   : > { %v558_v30 = vpop.permute.xlu1 %557 }
  0xc2   : > { %v693_v31 = vmul.f32 %v1591_v22, %v625_v27  ;;  %v563_v34 = vmul.f32 %v558_v30, %v542_v4 }
  0xc4   : > { %698 = vadd.xlane.f32.xlu1 %v693_v31  ;;  %v705_v49 = vmul.f32 %v693_v31, %v693_v31  ;;  %v567_v8 = vadd.f32 %v563_v34, %v537_v50  ;;  %v719_v31 = vld [vmem:[#allocation4 + $0x18] sm:$0xff] }
  0xc6   : > { %v597_v9 = vadd.f32 %v593_v7, %v567_v8 }
  0xca   : > { %v584_v48 = vpop.permute.xlu1 %583 }
  0xcb   : > { %v592_v51 = vmul.f32 %v584_v48, %v572_v5  ;;  %v717_v5 = vld [vmem:[#allocation4 + $0x8] sm:$0xff] }
  0xcc   : > { %710 = vadd.xlane.f32.xlu1 %v705_v49 }
  0xcd   : > { %v596_v40 = vadd.f32 %v592_v51, %v566_v21 }
  0xcf   : > { %v626_v25 = vadd.f32 %v622_v54, %v596_v40 }
  0xd1   : > { %v694_v60 = vmul.f32 %v1591_v22, %v626_v25 }
  0xd3   : > { %v606_v63 = vpop.permute.xlu1 %605  ;;  %700 = vadd.xlane.f32.xlu0 %v694_v60  ;;  %v706_v14 = vmul.f32 %v694_v60, %v694_v60 }
  0xd4   : > { %v620_v36 = vmul.f32 %v606_v63, %v602_v11 }
  0xd6   : > { %v624_v6 = vadd.f32 %v620_v36, %v594_v24 }
  0xd8   : > { %v1622_v26 = vpack.c.bf16 %v625_v27, %v624_v6  ;;  %v692_v41 = vmul.f32 %v1591_v22, %v624_v6 }
  0xda   : > { %1623 = vst [vmem:[#allocation2] sm:$0xff] %v1622_v26   ;;  %696 = vadd.xlane.f32.xlu2 %v692_v41  ;;  %v704_v53 = vmul.f32 %v692_v41, %v692_v41 }
  0xdb   : > { %v618_v46 = vpop.permute.xlu1 %617 }
  0xdc   : > { %v623_v10 = vmul.f32 %v618_v46, %v602_v11 }
  0xde   : > { %v627_v12 = vadd.f32 %v623_v10, %v597_v9 }
  0xe0   : > { %v1627_v37 = vpack.c.bf16 %v627_v12, %v626_v25  ;;  %v695_v13 = vmul.f32 %v1591_v22, %v627_v12 }
  0xe2   : > { %1655 = vst [vmem:[#allocation2 + $0x8] sm:$0xff] %v1627_v37   ;;  %708 = vadd.xlane.f32.xlu2 %v704_v53  ;;  %v707_v4 = vmul.f32 %v695_v13, %v695_v13 }
  0xe4   : > { %714 = vadd.xlane.f32.xlu0 %v707_v4 }
  0xea   : > { %702 = vadd.xlane.f32.xlu2 %v695_v13 }
  0xf2   : > { %712 = vadd.xlane.f32.xlu2 %v706_v14 }
 0x137   : > { %v699_v56 = vpop.xlane.xlu1 %698 }
 0x13f   : > { %v711_v11 = vpop.xlane.xlu1 %710 }
 0x140   : > { %v722_v15 = vsel %vm720_vm7, %v699_v56, %v711_v11 }
 0x141   : > { %v726_v16 = vadd.f32 %v722_v15, %v717_v5 }
 0x143   : > { %731 = vst.msk [vmem:[#allocation4 + $0x8] sm:$0xff] %vm729_vm8, %v726_v16 }
 0x146   : > { %v701_v27 = vpop.xlane.xlu0 %700 }
 0x14a   : > { %v735_v17 = vld [vmem:[#allocation4 + $0x8] sm:$0xff] }
 0x14b   : > { %v1994_v18 = vmul.f32 0.125, %v735_v17 }
 0x14d   : > { %v697_v20 = vpop.xlane.xlu2 %696  ;;  %v743_v22 = vmul.f32 %v1994_v18, %v1994_v18 }
 0x14f   : > { %752 = vrot.lane.b32.xlu2 %v743_v22, %s1792_s29 }
 0x155   : > { %v709_v28 = vpop.xlane.xlu2 %708 }
 0x156   : > { %v721_v29 = vsel %vm720_vm7, %v697_v20, %v709_v28 }
 0x157   : > { %v725_v30 = vadd.f32 %v721_v29, %v716_v47  ;;  %v715_v32 = vpop.xlane.xlu0 %714 }
 0x159   : > { %730 = vst.msk [vmem:[#allocation4] sm:$0xff] %vm729_vm8, %v725_v30 }
 0x15d   : > { %v703_v33 = vpop.xlane.xlu2 %702 }
 0x15e   : > { %v724_v19 = vsel %vm720_vm7, %v703_v33, %v715_v32 }
 0x15f   : > { %v728_v35 = vadd.f32 %v724_v19, %v719_v31 }
 0x160   : > { %v734_v38 = vld [vmem:[#allocation4] sm:$0xff] }
 0x161   : > { %733 = vst.msk [vmem:[#allocation4 + $0x18] sm:$0xff] %vm729_vm8, %v728_v35  ;;  %v2002_v39 = vmul.f32 0.125, %v734_v38 }
 0x163   : > { %v742_v42 = vmul.f32 %v2002_v39, %v2002_v39 }
 0x165   : > { %v713_v45 = vpop.xlane.xlu2 %712  ;;  %750 = vrot.lane.b32.xlu1 %v742_v42, %s1792_s29 }
 0x166   : > { %v723_v48 = vsel %vm720_vm7, %v701_v27, %v713_v45 }
 0x167   : > { %v727_v49 = vadd.f32 %v723_v48, %v718_v44 }
 0x168   : > { %v737_v21 = vld [vmem:[#allocation4 + $0x18] sm:$0xff] }
 0x169   : > { %732 = vst.msk [vmem:[#allocation4 + $0x10] sm:$0xff] %vm729_vm8, %v727_v49  ;;  %v2008_v51 = vmul.f32 0.125, %v737_v21 }
 0x16b   : > { %v745_v54 = vmul.f32 %v2008_v51, %v2008_v51 }
 0x16d   : > { %756 = vrot.lane.b32.xlu1 %v745_v54, %s1792_s29 }
 0x170   : > { %v736_v52 = vld [vmem:[#allocation4 + $0x10] sm:$0xff] }
 0x171   : > { %v2012_v55 = vmul.f32 0.125, %v736_v52 }
 0x173   : > { %v744_v57 = vmul.f32 %v2012_v55, %v2012_v55 }
 0x175   : > { %754 = vrot.lane.b32.xlu0 %v744_v57, %s1792_s29 }
 0x1a9   : > { %v753_v40 = vpop.permute.xlu2 %752 }
 0x1aa   : > { %v763_v58 = vsub.f32 %v1994_v18, %v753_v40 }
 0x1ac   : > { %v767_v23 = vmax.f32 %v763_v58, 0.0 }
 0x1ae   : > { %v771_v25 = vadd.f32 1e-05, %v767_v23 }
 0x1b0   : > { %1729 = vrsqrt.f32 %v771_v25  ;;  %vm790_vm10 = vweird.f32 %v771_v25 }
 0x1b6   : > { %v1730_v43 = vpop.eup %1729 }
 0x1b7   : > { %v785_v59 = vmul.f32 %v1730_v43, %v771_v25  ;;  %vm791_vm9 = vweird.f32 %v1730_v43 }
 0x1b8   : > { %vm792_vm11 = vmor %vm790_vm10, %vm791_vm9 }
 0x1b9   : > { %v786_v60 = vmul.f32 %v1730_v43, %v785_v59 }
 0x1bb   : > { %v787_v61 = vmul.f32 0.5, %v786_v60 }
 0x1bd   : > { %v788_v62 = vsub.f32 1.5, %v787_v61 }
 0x1bf   : > { %v789_v63 = vmul.f32 %v1730_v43, %v788_v62 }
 0x1c1   : > { %v793_v24 = vsel %vm792_vm11, %v1730_v43, %v789_v63 }
 0x1c2   : > { %820 = vrot.lane.b32.xlu2 %v793_v24, %s1793_s30 }
 0x1d7   : > { %v751_v34 = vpop.permute.xlu1 %750 }
 0x1d8   : > { %v762_v36 = vsub.f32 %v2002_v39, %v751_v34 }
 0x1da   : > { %v766_v50 = vmax.f32 %v762_v36, 0.0 }
 0x1dc   : > { %v770_v6 = vadd.f32 1e-05, %v766_v50 }
 0x1de   : > { %1731 = vrsqrt.f32 %v770_v6  ;;  %vm780_vm13 = vweird.f32 %v770_v6 }
 0x1df   : > { %v757_v7 = vpop.permute.xlu1 %756 }
 0x1e0   : > { %v765_v8 = vsub.f32 %v2008_v51, %v757_v7 }
 0x1e2   : > { %v769_v26 = vmax.f32 %v765_v8, 0.0 }
 0x1e4   : > { %v1732_v41 = vpop.eup %1731  ;;  %v773_v46 = vadd.f32 1e-05, %v769_v26 }
 0x1e5   : > { %v775_v9 = vmul.f32 %v1732_v41, %v770_v6  ;;  %vm781_vm12 = vweird.f32 %v1732_v41 }
 0x1e6   : > { %1733 = vrsqrt.f32 %v773_v46  ;;  %vm782_vm14 = vmor %vm780_vm13, %vm781_vm12  ;;  %vm810_vm0 = vweird.f32 %v773_v46 }
 0x1e7   : > { %v776_v10 = vmul.f32 %v1732_v41, %v775_v9  ;;  %v755_v12 = vpop.permute.xlu0 %754 }
 0x1e8   : > { %v764_v37 = vsub.f32 %v2012_v55, %v755_v12 }
 0x1e9   : > { %v777_v53 = vmul.f32 0.5, %v776_v10 }
 0x1ea   : > { %v768_v13 = vmax.f32 %v764_v37, 0.0 }
 0x1eb   : > { %v778_v4 = vsub.f32 1.5, %v777_v53 }
 0x1ec   : > { %v1734_v14 = vpop.eup %1733  ;;  %v772_v56 = vadd.f32 1e-05, %v768_v13 }
 0x1ed   : > { %v805_v5 = vmul.f32 %v1734_v14, %v773_v46  ;;  %v779_v11 = vmul.f32 %v1732_v41, %v778_v4  ;;  %vm811_vm15 = vweird.f32 %v1734_v14 }
 0x1ee   : > { %1735 = vrsqrt.f32 %v772_v56  ;;  %vm812_vm1 = vmor %vm810_vm0, %vm811_vm15  ;;  %vm800_vm3 = vweird.f32 %v772_v56 }
 0x1ef   : > { %v806_v15 = vmul.f32 %v1734_v14, %v805_v5  ;;  %v783_v16 = vsel %vm782_vm14, %v1732_v41, %v779_v11 }
 0x1f0   : > { %818 = vrot.lane.b32.xlu0 %v783_v16, %s1793_s30 }
 0x1f1   : > { %v807_v17 = vmul.f32 0.5, %v806_v15 }
 0x1f3   : > { %v808_v20 = vsub.f32 1.5, %v807_v17 }
 0x1f4   : > { %v1736_v22 = vpop.eup %1735 }
 0x1f5   : > { %v795_v47 = vmul.f32 %v1736_v22, %v772_v56  ;;  %v809_v27 = vmul.f32 %v1734_v14, %v808_v20  ;;  %vm801_vm2 = vweird.f32 %v1736_v22 }
 0x1f6   : > { %vm802_vm4 = vmor %vm800_vm3, %vm801_vm2 }
 0x1f7   : > { %v796_v28 = vmul.f32 %v1736_v22, %v795_v47  ;;  %v813_v29 = vsel %vm812_vm1, %v1734_v14, %v809_v27 }
 0x1f8   : > { %824 = vrot.lane.b32.xlu0 %v813_v29, %s1793_s30 }
 0x1f9   : > { %v797_v30 = vmul.f32 0.5, %v796_v28 }
 0x1fb   : > { %v798_v31 = vsub.f32 1.5, %v797_v30 }
 0x1fd   : > { %v799_v32 = vmul.f32 %v1736_v22, %v798_v31 }
 0x1ff   : > { %v803_v33 = vsel %vm802_vm4, %v1736_v22, %v799_v32 }
 0x200   : > { %822 = vrot.lane.b32.xlu1 %v803_v33, %s1793_s30 }
 0x21c   : > { %v821_v19 = vpop.permute.xlu2 %820 }
 0x21d   : > { %v831_v35 = vmul.f32 %v821_v19, %v1876_v1 }
 0x21f   : > { %840 = vrot.lane.b32.xlu1 %v831_v35, %s1794_s8 }
 0x262   : > { %v819_v38 = vpop.permute.xlu0 %818 }
 0x263   : > { %v830_v42 = vmul.f32 %v819_v38, %v1871_v0 }
 0x265   : > { %838 = vrot.lane.b32.xlu2 %v830_v42, %s1794_s8 }
 0x26a   : > { %v825_v44 = vpop.permute.xlu0 %824 }
 0x26b   : > { %v833_v45 = vmul.f32 %v825_v44, %v1886_v3 }
 0x26d   : > { %844 = vrot.lane.b32.xlu2 %v833_v45, %s1794_s8 }
 0x272   : > { %v823_v48 = vpop.permute.xlu1 %822 }
 0x273   : > { %v832_v49 = vmul.f32 %v823_v48, %v1881_v2 }
 0x275   : > { %842 = vrot.lane.b32.xlu0 %v832_v49, %s1794_s8 }
 0x291   : > { %v841_v21 = vpop.permute.xlu1 %840 }
 0x292   : > { %v851_v54 = vmul.f32 %v841_v21, %v1994_v18 }
 0x294   : > { %860 = vrot.lane.b32.xlu0 %v851_v54, %s1795_s9 }
 0x2bf   : > { %v839_v52 = vpop.permute.xlu2 %838 }
 0x2c0   : > { %v850_v57 = vmul.f32 %v839_v52, %v2002_v39 }
 0x2c2   : > { %858 = vrot.lane.b32.xlu1 %v850_v57, %s1795_s9 }
 0x2c7   : > { %v845_v40 = vpop.permute.xlu2 %844 }
 0x2c8   : > { %v853_v58 = vmul.f32 %v845_v40, %v2008_v51 }
 0x2ca   : > { %864 = vrot.lane.b32.xlu1 %v853_v58, %s1795_s9 }
 0x2e7   : > { %v843_v23 = vpop.permute.xlu0 %842 }
 0x2e8   : > { %v852_v25 = vmul.f32 %v843_v23, %v2012_v55 }
 0x2ea   : > { %862 = vrot.lane.b32.xlu2 %v852_v25, %s1795_s9 }
 0x306   : > { %v861_v43 = vpop.permute.xlu0 %860 }
 0x307   : > { %v871_v59 = vsub.f32 %v1876_v1, %v861_v43 }
 0x309   : > { %880 = vrot.lane.b32.xlu2 %v871_v59, %s1794_s8 }
 0x334   : > { %v859_v18 = vpop.permute.xlu1 %858 }
 0x335   : > { %v870_v60 = vsub.f32 %v1871_v0, %v859_v18 }
 0x337   : > { %878 = vrot.lane.b32.xlu0 %v870_v60, %s1794_s8 }
 0x33c   : > { %v865_v39 = vpop.permute.xlu1 %864 }
 0x33d   : > { %v873_v61 = vsub.f32 %v1886_v3, %v865_v39 }
 0x33f   : > { %884 = vrot.lane.b32.xlu0 %v873_v61, %s1794_s8 }
 0x344   : > { %v863_v51 = vpop.permute.xlu2 %862 }
 0x345   : > { %v872_v62 = vsub.f32 %v1881_v2, %v863_v51 }
 0x347   : > { %882 = vrot.lane.b32.xlu1 %v872_v62, %s1794_s8 }
 0x363   : > { %v881_v55 = vpop.permute.xlu2 %880 }
 0x364   : > { %v891_v63 = vsel %vm720_vm7, %v841_v21, %v881_v55 }
 0x365   : > { %900 = vrot.lane.b32.xlu1 %v891_v63, %s1796_s10 }
 0x3a9   : > { %v879_v24 = vpop.permute.xlu0 %878 }
 0x3aa   : > { %v890_v34 = vsel %vm720_vm7, %v839_v52, %v879_v24 }
 0x3ab   : > { %898 = vrot.lane.b32.xlu2 %v890_v34, %s1796_s10 }
 0x3b1   : > { %v885_v36 = vpop.permute.xlu0 %884 }
 0x3b2   : > { %v893_v50 = vsel %vm720_vm7, %v845_v40, %v885_v36 }
 0x3b3   : > { %904 = vrot.lane.b32.xlu2 %v893_v50, %s1796_s10 }
 0x3b9   : > { %v883_v6 = vpop.permute.xlu1 %882 }
 0x3ba   : > { %v892_v7 = vsel %vm720_vm7, %v843_v23, %v883_v6 }
 0x3bb   : > { %902 = vrot.lane.b32.xlu0 %v892_v7, %s1796_s10 }
 0x3d7   : > { %v901_v8 = vpop.permute.xlu1 %900 }
 0x3d8   : > { %912 = vst.msk [vmem:[#allocation4 + $0x8] sm:$0xff] %vm910_vm5, %v901_v8 }
 0x405   : > { %v899_v26 = vpop.permute.xlu2 %898 }
 0x406   : > { %911 = vst.msk [vmem:[#allocation4] sm:$0xff] %vm910_vm5, %v899_v26 }
 0x40d   : > { %v905_v41 = vpop.permute.xlu2 %904 }
 0x40e   : > { %914 = vst.msk [vmem:[#allocation4 + $0x18] sm:$0xff] %vm910_vm5, %v905_v41 }
 0x42d   : > { %v903_v46 = vpop.permute.xlu0 %902 }
 0x42e   : > { %913 = vst.msk [vmem:[#allocation4 + $0x10] sm:$0xff] %vm910_vm5, %v903_v46 }
 0x42f PF: > { %p1592_p5 = scmp.ne.s32.totalorder %s1774_s24, 1 }
 0x430   : > { %s1800_s15 = smov (!%p1592_p5), 4   ;;  %s1801_s16 = smov (!%p1592_p5), 1  }
 0x431   : > { %918 = sbr.rel (%p1592_p5) target bundleno = 2317 (0x90d), region = 68  ;;  %s1802_s17 = smov (!%p1592_p5), 123  }
 0x432   : > { %s1803_s18 = smov (!%p1592_p5), 6   ;;  %s1804_s19 = smov (!%p1592_p5), 119  }
 0x436   : > { %v2049_v9 = vld [vmem:[#allocation4 + $0x10] sm:$0xff]  ;;  %v1797_v10 = vmov 3   ;;  %v1798_v12 = vmov 2   ;;  %v2053_v37 = vld [vmem:[#allocation4] sm:$0xff]  ;;  %v2056_v53 = vld [vmem:[#allocation4 + $0x18] sm:$0xff]  ;;  %vm999_vm6 = vcmask 261120   ;;  %v1096_v40 = vlaneseq }
 0x437   : > { %1738 = vset.pattern.permute.xlu1 %v1797_v10  ;;  %1737 = vset.pattern.permute.xlu0 %v1798_v12  ;;  %v2060_v13 = vld [vmem:[#allocation4 + $0x8] sm:$0xff]  ;;  %v1630_v17 = vld [vmem:[#allocation2] sm:$0xff]   ;;  %v1799_v23 = vmov 0.0   ;;  %vm1131_vm8 = vcmask 7168   ;;  %vm1156_vm9 = vcmask 48160  }
 0x438   : > { %968 = vperm.xlu1 %1738, %v2049_v9   ;;  %947 = vperm.xlu0 %1737, %v2049_v9   ;;  %v1656_v4 = vld [vmem:[#allocation2 + $0x8] sm:$0xff]   ;;  %v1632_v28 = vunpack.c.h.bf16 %v1630_v17  ;;  %v1631_v30 = vunpack.c.l.bf16 %v1630_v17  ;;  %v1616_v52 = vld [vmem:[%s2160_s4] sm:$0xff]  ;;  %v1097_v58 = vand.u32 127, %v1096_v40 }
 0x439   : > { %1739 = vset.pattern.permute.xlu2 %v1798_v12  ;;  %v1635_v5 = vunpack.c.l.bf16 %v1656_v4  ;;  %v1636_v16 = vunpack.c.h.bf16 %v1656_v4  ;;  %v1617_v57 = vld [vmem:[%s2160_s4 + $0x8] sm:$0xff] }
 0x43a   : > { %937 = vperm.xlu2 %1739, %v2053_v37   ;;  %vm1100_vm7 = vcmp.lt.s32.totalorder %v1097_v58, 8 }
 0x43b   : > { %v1603_v25 = vsel %vm1100_vm7, 1.0, %v1799_v23 }
 0x440   : > { %972 = vperm.xlu1 %1738, %v2056_v53   ;;  %952 = vperm.xlu0 %1737, %v2056_v53  }
 0x442   : > { %942 = vperm.xlu2 %1739, %v2060_v13  }
 0x448   : > { %1740 = vset.pattern.permute.xlu0 %v1797_v10  ;;  %964 = vperm.xlu1 %1738, %v2060_v13  }
 0x449   : > { %960 = vperm.xlu0 %1740, %v2053_v37  }
 0x494   : > { %v938_v11 = vpop.permute.xlu2 %937 }
 0x495   : > { %v955_v38 = vmul.f32 %v1631_v30, %v938_v11 }
 0x49c   : > { %v943_v31 = vpop.permute.xlu2 %942 }
 0x49d   : > { %v956_v19 = vmul.f32 %v1632_v28, %v943_v31 }
 0x4aa   : > { %v969_v14 = vpop.permute.xlu1 %968  ;;  %v948_v56 = vpop.permute.xlu0 %947 }
 0x4ab   : > { %v957_v15 = vmul.f32 %v1635_v5, %v948_v56 }
 0x4ad   : > { %v977_v47 = vadd.f32 %v969_v14, %v957_v15 }
 0x4af   : > { %v981_v32 = vmax.f32 %v977_v47, 0.0 }
 0x4b2   : > { %v973_v20 = vpop.permute.xlu1 %972  ;;  %v953_v22 = vpop.permute.xlu0 %952 }
 0x4b3   : > { %v958_v27 = vmul.f32 %v1636_v16, %v953_v22 }
 0x4b5   : > { %v978_v29 = vadd.f32 %v973_v20, %v958_v27 }
 0x4b7   : > { %v982_v33 = vmax.f32 %v978_v29, 0.0 }
 0x4b9   : > { %v988_v35 = vpack.c.bf16 %v982_v33, %v981_v32 }
 0x4ba   : > { %v965_v42 = vpop.permute.xlu1 %964 }
 0x4bb   : > { %v976_v44 = vadd.f32 %v965_v42, %v956_v19  ;;  %v961_v45 = vpop.permute.xlu0 %960  ;;  %1012 = vmatpush.bf16.msra.mxu0 %v988_v35  ;;  %1660 = vmatpush.bf16.msra.mxu1 %v988_v35 }
 0x4bc   : > { %v975_v48 = vadd.f32 %v961_v45, %v955_v38 }
 0x4bd   : > { %v980_v49 = vmax.f32 %v976_v44, 0.0 }
 0x4be   : > { %v979_v21 = vmax.f32 %v975_v48, 0.0 }
 0x4c0   : > { %v987_v54 = vpack.c.bf16 %v980_v49, %v979_v21 }
 0x4c2   : > { %1013 = vmatpush.bf16.msra.mxu0 %v987_v54  ;;  %1661 = vmatpush.bf16.msra.mxu1 %v987_v54 }
 0x4c5   : > { %1601 = vmatmul.msk.bf16.vlgmr.msra.gmra.mxu0 %vm999_vm6, %v1616_v52  ;;  %1602 = vmatmul.msk.bf16.vlgmr.msra.gmra.mxu1 %vm999_vm6, %v1617_v57  ;;  %vm1349_vm6 = vcmask 64560  }
 0x542   : > { %v1015_v43 = vpop.f32.mrf.mxu0  ;;  %v1020_v59 = vpop.f32.mrf.mxu1 }
 0x543   : > { %v1103_v18 = vmul.f32 %v1603_v25, %v1015_v43  ;;  %v1105_v60 = vmul.f32 %v1603_v25, %v1020_v59 }
 0x545   : > { %1107 = vadd.xlane.f32.xlu2 %v1103_v18  ;;  %1111 = vadd.xlane.f32.xlu0 %v1105_v60  ;;  %v1115_v61 = vmul.f32 %v1103_v18, %v1103_v18  ;;  %v1117_v36 = vmul.f32 %v1105_v60, %v1105_v60 }
 0x54a   : > { %v1017_v39 = vpop.f32.mrf.mxu0  ;;  %v1022_v51 = vpop.f32.mrf.mxu1 }
 0x54b   : > { %v1640_v62 = vpack.c.bf16 %v1017_v39, %v1015_v43  ;;  %v1104_v55 = vmul.f32 %v1603_v25, %v1017_v39  ;;  %v1645_v63 = vpack.c.bf16 %v1022_v51, %v1020_v59  ;;  %v1106_v24 = vmul.f32 %v1603_v25, %v1022_v51 }
 0x54d   : > { %1641 = vst [vmem:[#allocation3 + $0x8] sm:$0xff] %v1640_v62   ;;  %1119 = vadd.xlane.f32.xlu2 %v1115_v61  ;;  %1109 = vadd.xlane.f32.xlu1 %v1104_v55  ;;  %v1118_v34 = vmul.f32 %v1106_v24, %v1106_v24  ;;  %v1116_v50 = vmul.f32 %v1104_v55, %v1104_v55 }
 0x54e   : > { %1657 = vst [vmem:[#allocation3] sm:$0xff] %v1645_v63  }
 0x54f   : > { %1125 = vadd.xlane.f32.xlu0 %v1118_v34 }
 0x555   : > { %1123 = vadd.xlane.f32.xlu2 %v1117_v36  ;;  %1121 = vadd.xlane.f32.xlu1 %v1116_v50 }
 0x55d   : > { %1113 = vadd.xlane.f32.xlu2 %v1106_v24 }
 0x5b8   : > { %v1108_v6 = vpop.xlane.xlu2 %1107  ;;  %v1112_v41 = vpop.xlane.xlu0 %1111 }
 0x5c0   : > { %v1120_v7 = vpop.xlane.xlu2 %1119  ;;  %v1110_v8 = vpop.xlane.xlu1 %1109 }
 0x5c1   : > { %v1132_v26 = vsel %vm1131_vm8, %v1108_v6, %v1120_v7 }
 0x5c2   : > { %1140 = vrot.lane.b32.xlu1 %v1132_v26, %s1800_s15  ;;  %v1126_v14 = vpop.xlane.xlu0 %1125 }
 0x5c8   : > { %v1124_v46 = vpop.xlane.xlu2 %1123  ;;  %v1122_v10 = vpop.xlane.xlu1 %1121 }
 0x5c9   : > { %v1134_v12 = vsel %vm1131_vm8, %v1112_v41, %v1124_v46  ;;  %v1133_v4 = vsel %vm1131_vm8, %v1110_v8, %v1122_v10 }
 0x5ca   : > { %1144 = vrot.lane.b32.xlu0 %v1134_v12, %s1800_s15  ;;  %1142 = vrot.lane.b32.xlu2 %v1133_v4, %s1800_s15 }
 0x5d0   : > { %v1114_v56 = vpop.xlane.xlu2 %1113 }
 0x5d1   : > { %v1135_v5 = vsel %vm1131_vm8, %v1114_v56, %v1126_v14 }
 0x5d2   : > { %1146 = vrot.lane.b32.xlu1 %v1135_v5, %s1800_s15 }
 0x624   : > { %v1143_v11 = vpop.permute.xlu2 %1142 }
 0x625   : > { %v1153_v15 = vadd.f32 %v1143_v11, %v2060_v13 }
 0x627   : > { %1158 = vst.msk [vmem:[#allocation4 + $0x8] sm:$0xff] %vm1156_vm9, %v1153_v15 }
 0x62e   : > { %v1162_v16 = vld [vmem:[#allocation4 + $0x8] sm:$0xff] }
 0x62f   : > { %v2081_v17 = vmul.f32 0.125, %v1162_v16 }
 0x631   : > { %v1170_v20 = vmul.f32 %v2081_v17, %v2081_v17 }
 0x633   : > { %1179 = vrot.lane.b32.xlu2 %v1170_v20, %s1801_s16 }
 0x634   : > { %v1141_v22 = vpop.permute.xlu1 %1140 }
 0x635   : > { %v1152_v47 = vadd.f32 %v1141_v22, %v2053_v37 }
 0x637   : > { %1157 = vst.msk [vmem:[#allocation4] sm:$0xff] %vm1156_vm9, %v1152_v47 }
 0x63c   : > { %v1145_v27 = vpop.permute.xlu0 %1144 }
 0x63d   : > { %v1154_v28 = vadd.f32 %v1145_v27, %v2049_v9 }
 0x63e   : > { %v1161_v29 = vld [vmem:[#allocation4] sm:$0xff] }
 0x63f   : > { %1159 = vst.msk [vmem:[#allocation4 + $0x10] sm:$0xff] %vm1156_vm9, %v1154_v28  ;;  %v2089_v13 = vmul.f32 0.125, %v1161_v29 }
 0x641   : > { %v1169_v30 = vmul.f32 %v2089_v13, %v2089_v13 }
 0x643   : > { %1177 = vrot.lane.b32.xlu0 %v1169_v30, %s1801_s16 }
 0x644   : > { %v1147_v31 = vpop.permute.xlu1 %1146 }
 0x645   : > { %v1155_v32 = vadd.f32 %v1147_v31, %v2056_v53 }
 0x646   : > { %v1163_v33 = vld [vmem:[#allocation4 + $0x10] sm:$0xff] }
 0x647   : > { %1160 = vst.msk [vmem:[#allocation4 + $0x18] sm:$0xff] %vm1156_vm9, %v1155_v32  ;;  %v2095_v37 = vmul.f32 0.125, %v1163_v33 }
 0x649   : > { %v1171_v9 = vmul.f32 %v2095_v37, %v2095_v37 }
 0x64b   : > { %1181 = vrot.lane.b32.xlu1 %v1171_v9, %s1801_s16 }
 0x64e   : > { %v1164_v19 = vld [vmem:[#allocation4 + $0x18] sm:$0xff] }
 0x64f   : > { %v2099_v35 = vmul.f32 0.125, %v1164_v19 }
 0x651   : > { %v1172_v38 = vmul.f32 %v2099_v35, %v2099_v35 }
 0x653   : > { %1183 = vrot.lane.b32.xlu0 %v1172_v38, %s1801_s16 }
 0x68d   : > { %v1180_v42 = vpop.permute.xlu2 %1179 }
 0x68e   : > { %v1190_v44 = vsub.f32 %v2081_v17, %v1180_v42 }
 0x690   : > { %v1194_v53 = vmax.f32 %v1190_v44, 0.0 }
 0x692   : > { %v1198_v45 = vadd.f32 1e-05, %v1194_v53 }
 0x694   : > { %1741 = vrsqrt.f32 %v1198_v45  ;;  %vm1217_vm11 = vweird.f32 %v1198_v45 }
 0x69a   : > { %v1742_v48 = vpop.eup %1741 }
 0x69b   : > { %v1212_v49 = vmul.f32 %v1742_v48, %v1198_v45  ;;  %vm1218_vm10 = vweird.f32 %v1742_v48 }
 0x69c   : > { %vm1219_vm12 = vmor %vm1217_vm11, %vm1218_vm10 }
 0x69d   : > { %v1213_v21 = vmul.f32 %v1742_v48, %v1212_v49 }
 0x69f   : > { %v1214_v54 = vmul.f32 0.5, %v1213_v21 }
 0x6a1   : > { %v1215_v52 = vsub.f32 1.5, %v1214_v54 }
 0x6a3   : > { %v1216_v57 = vmul.f32 %v1742_v48, %v1215_v52 }
 0x6a5   : > { %v1220_v40 = vsel %vm1219_vm12, %v1742_v48, %v1216_v57 }
 0x6a6   : > { %1247 = vrot.lane.b32.xlu1 %v1220_v40, %s1800_s15 }
 0x6b5   : > { %v1178_v58 = vpop.permute.xlu0 %1177 }
 0x6b6   : > { %v1189_v23 = vsub.f32 %v2089_v13, %v1178_v58 }
 0x6b8   : > { %v1193_v25 = vmax.f32 %v1189_v23, 0.0 }
 0x6ba   : > { %v1197_v43 = vadd.f32 1e-05, %v1193_v25 }
 0x6bc   : > { %1743 = vrsqrt.f32 %v1197_v43  ;;  %vm1207_vm14 = vweird.f32 %v1197_v43 }
 0x6bd   : > { %v1182_v59 = vpop.permute.xlu1 %1181 }
 0x6be   : > { %v1191_v18 = vsub.f32 %v2095_v37, %v1182_v59 }
 0x6c0   : > { %v1195_v60 = vmax.f32 %v1191_v18, 0.0 }
 0x6c2   : > { %v1744_v39 = vpop.eup %1743  ;;  %v1199_v61 = vadd.f32 1e-05, %v1195_v60 }
 0x6c3   : > { %v1202_v51 = vmul.f32 %v1744_v39, %v1197_v43  ;;  %vm1208_vm13 = vweird.f32 %v1744_v39 }
 0x6c4   : > { %1745 = vrsqrt.f32 %v1199_v61  ;;  %vm1209_vm15 = vmor %vm1207_vm14, %vm1208_vm13  ;;  %vm1227_vm1 = vweird.f32 %v1199_v61 }
 0x6c5   : > { %v1203_v62 = vmul.f32 %v1744_v39, %v1202_v51  ;;  %v1184_v55 = vpop.permute.xlu0 %1183 }
 0x6c6   : > { %v1192_v63 = vsub.f32 %v2099_v35, %v1184_v55 }
 0x6c7   : > { %v1204_v24 = vmul.f32 0.5, %v1203_v62 }
 0x6c8   : > { %v1196_v34 = vmax.f32 %v1192_v63, 0.0 }
 0x6c9   : > { %v1205_v36 = vsub.f32 1.5, %v1204_v24 }
 0x6ca   : > { %v1746_v50 = vpop.eup %1745  ;;  %v1200_v6 = vadd.f32 1e-05, %v1196_v34 }
 0x6cb   : > { %v1222_v7 = vmul.f32 %v1746_v50, %v1199_v61  ;;  %v1206_v8 = vmul.f32 %v1744_v39, %v1205_v36  ;;  %vm1228_vm0 = vweird.f32 %v1746_v50 }
 0x6cc   : > { %1747 = vrsqrt.f32 %v1200_v6  ;;  %vm1229_vm2 = vmor %vm1227_vm1, %vm1228_vm0  ;;  %vm1237_vm4 = vweird.f32 %v1200_v6 }
 0x6cd   : > { %v1223_v26 = vmul.f32 %v1746_v50, %v1222_v7  ;;  %v1210_v41 = vsel %vm1209_vm15, %v1744_v39, %v1206_v8 }
 0x6ce   : > { %1245 = vrot.lane.b32.xlu2 %v1210_v41, %s1800_s15 }
 0x6cf   : > { %v1224_v46 = vmul.f32 0.5, %v1223_v26 }
 0x6d1   : > { %v1225_v10 = vsub.f32 1.5, %v1224_v46 }
 0x6d2   : > { %v1748_v12 = vpop.eup %1747 }
 0x6d3   : > { %v1232_v4 = vmul.f32 %v1748_v12, %v1200_v6  ;;  %v1226_v14 = vmul.f32 %v1746_v50, %v1225_v10  ;;  %vm1238_vm3 = vweird.f32 %v1748_v12 }
 0x6d4   : > { %vm1239_vm5 = vmor %vm1237_vm4, %vm1238_vm3 }
 0x6d5   : > { %v1233_v56 = vmul.f32 %v1748_v12, %v1232_v4  ;;  %v1230_v5 = vsel %vm1229_vm2, %v1746_v50, %v1226_v14 }
 0x6d6   : > { %1249 = vrot.lane.b32.xlu0 %v1230_v5, %s1800_s15 }
 0x6d7   : > { %v1234_v11 = vmul.f32 0.5, %v1233_v56 }
 0x6d9   : > { %v1235_v15 = vsub.f32 1.5, %v1234_v11 }
 0x6db   : > { %v1236_v16 = vmul.f32 %v1748_v12, %v1235_v15 }
 0x6dd   : > { %v1240_v20 = vsel %vm1239_vm5, %v1748_v12, %v1236_v16 }
 0x6de   : > { %1251 = vrot.lane.b32.xlu2 %v1240_v20, %s1800_s15 }
 0x718   : > { %v1248_v22 = vpop.permute.xlu1 %1247 }
 0x719   : > { %v1258_v47 = vmul.f32 %v1248_v22, %v1876_v1 }
 0x71b   : > { %1267 = vrot.lane.b32.xlu0 %v1258_v47, %s1802_s17 }
 0x728   : > { %v1246_v27 = vpop.permute.xlu2 %1245 }
 0x729   : > { %v1257_v28 = vmul.f32 %v1246_v27, %v1871_v0 }
 0x72b   : > { %1265 = vrot.lane.b32.xlu1 %v1257_v28, %s1802_s17 }
 0x738   : > { %v1252_v29 = vpop.permute.xlu2 %1251 }
 0x739   : > { %v1260_v30 = vmul.f32 %v1252_v29, %v1886_v3 }
 0x73b   : > { %1271 = vrot.lane.b32.xlu1 %v1260_v30, %s1802_s17 }
 0x748   : > { %v1250_v31 = vpop.permute.xlu0 %1249 }
 0x749   : > { %v1259_v32 = vmul.f32 %v1250_v31, %v1881_v2 }
 0x74b   : > { %1269 = vrot.lane.b32.xlu2 %v1259_v32, %s1802_s17 }
 0x78d   : > { %v1268_v33 = vpop.permute.xlu0 %1267 }
 0x78e   : > { %v1278_v9 = vmul.f32 %v1268_v33, %v2081_v17 }
 0x790   : > { %1287 = vrot.lane.b32.xlu2 %v1278_v9, %s1803_s18 }
 0x798   : > { %1301 = vrot.lane.b32.xlu2 %v1257_v28, %s1804_s19 }
 0x79d   : > { %v1266_v19 = vpop.permute.xlu1 %1265 }
 0x79e   : > { %v1277_v38 = vmul.f32 %v1266_v19, %v2089_v13 }
 0x7a0   : > { %1307 = vrot.lane.b32.xlu2 %v1260_v30, %s1804_s19  ;;  %1285 = vrot.lane.b32.xlu0 %v1277_v38, %s1803_s18 }
 0x7a5   : > { %v1270_v42 = vpop.permute.xlu2 %1269 }
 0x7a6   : > { %v1279_v44 = vmul.f32 %v1270_v42, %v2095_v37 }
 0x7a8   : > { %1289 = vrot.lane.b32.xlu1 %v1279_v44, %s1803_s18 }
 0x7ad   : > { %v1272_v53 = vpop.permute.xlu1 %1271 }
 0x7ae   : > { %v1280_v45 = vmul.f32 %v1272_v53, %v2099_v35 }
 0x7b0   : > { %1303 = vrot.lane.b32.xlu1 %v1258_v47, %s1804_s19  ;;  %1291 = vrot.lane.b32.xlu0 %v1280_v45, %s1803_s18 }
 0x7b8   : > { %1305 = vrot.lane.b32.xlu0 %v1259_v32, %s1804_s19 }
 0x7ea   : > { %v1288_v17 = vpop.permute.xlu2 %1287 }
 0x7eb   : > { %v1298_v48 = vsub.f32 %v1876_v1, %v1288_v17 }
 0x7ed   : > { %1319 = vrot.lane.b32.xlu0 %v1298_v48, %s1804_s19 }
 0x7f2   : > { %v1302_v23 = vpop.permute.xlu2 %1301 }
 0x7fa   : > { %v1308_v25 = vpop.permute.xlu2 %1307 }
 0x812   : > { %v1286_v13 = vpop.permute.xlu0 %1285 }
 0x813   : > { %v1297_v49 = vsub.f32 %v1871_v0, %v1286_v13 }
 0x815   : > { %1317 = vrot.lane.b32.xlu1 %v1297_v49, %s1804_s19 }
 0x81a   : > { %v1290_v21 = vpop.permute.xlu1 %1289 }
 0x81b   : > { %v1299_v37 = vsub.f32 %v1881_v2, %v1290_v21 }
 0x81d   : > { %1321 = vrot.lane.b32.xlu2 %v1299_v37, %s1804_s19 }
 0x822   : > { %v1292_v54 = vpop.permute.xlu0 %1291  ;;  %v1304_v57 = vpop.permute.xlu1 %1303 }
 0x823   : > { %v1300_v52 = vsub.f32 %v1886_v3, %v1292_v54 }
 0x825   : > { %1323 = vrot.lane.b32.xlu1 %v1300_v52, %s1804_s19 }
 0x82a   : > { %v1306_v35 = vpop.permute.xlu0 %1305 }
 0x85f   : > { %v1320_v40 = vpop.permute.xlu0 %1319 }
 0x860   : > { %v1330_v58 = vsel %vm1131_vm8, %v1304_v57, %v1320_v40 }
 0x861   : > { %1339 = vrot.lane.b32.xlu2 %v1330_v58, %s1803_s18 }
 0x877   : > { %v1322_v43 = vpop.permute.xlu2 %1321 }
 0x878   : > { %v1331_v59 = vsel %vm1131_vm8, %v1306_v35, %v1322_v43 }
 0x879   : > { %1341 = vrot.lane.b32.xlu1 %v1331_v59, %s1803_s18 }
 0x887   : > { %v1318_v2 = vpop.permute.xlu1 %1317 }
 0x888   : > { %v1329_v18 = vsel %vm1131_vm8, %v1302_v23, %v1318_v2 }
 0x889   : > { %1337 = vrot.lane.b32.xlu0 %v1329_v18, %s1803_s18 }
 0x897   : > { %v1324_v3 = vpop.permute.xlu1 %1323 }
 0x898   : > { %v1332_v60 = vsel %vm1131_vm8, %v1308_v25, %v1324_v3 }
 0x899   : > { %1343 = vrot.lane.b32.xlu0 %v1332_v60, %s1803_s18 }
 0x8bb   : > { %v1340_v39 = vpop.permute.xlu2 %1339 }
 0x8bc   : > { %1351 = vst.msk [vmem:[#allocation4 + $0x8] sm:$0xff] %vm1349_vm6, %v1340_v39 }
 0x8eb   : > { %v1342_v61 = vpop.permute.xlu1 %1341 }
 0x8ec   : > { %1352 = vst.msk [vmem:[#allocation4 + $0x10] sm:$0xff] %vm1349_vm6, %v1342_v61 }
 0x8fb   : > { %v1338_v51 = vpop.permute.xlu0 %1337 }
 0x8fc   : > { %1350 = vst.msk [vmem:[#allocation4] sm:$0xff] %vm1349_vm6, %v1338_v51 }
 0x90b   : > { %v1344_v62 = vpop.permute.xlu0 %1343 }
 0x90c   : > { %1353 = vst.msk [vmem:[#allocation4 + $0x18] sm:$0xff] %vm1349_vm6, %v1344_v62 }
 0x90d PF: > { %p1604_p6 = scmp.ne.s32.totalorder %s1774_s24, 2 }
 0x90f   : > { %1357 = sbr.rel (%p1604_p6) target bundleno = 2632 (0xa48), region = 80 }
 0x914   : > { %v1372_v55 = vld [vmem:[#allocation4 + $0x10] sm:$0xff]  ;;  %v1805_v63 = vmov 7   ;;  %v1806_v24 = vmov 6   ;;  %v1370_v34 = vld [vmem:[#allocation4] sm:$0xff]  ;;  %v1373_v36 = vld [vmem:[#allocation4 + $0x18] sm:$0xff]  ;;  %v1807_v6 = vmov 11  }
 0x915   : > { %1750 = vset.pattern.permute.xlu1 %v1805_v63  ;;  %1749 = vset.pattern.permute.xlu0 %v1806_v24  ;;  %v1371_v50 = vld [vmem:[#allocation4 + $0x8] sm:$0xff]  ;;  %v1658_v7 = vld [vmem:[#allocation3] sm:$0xff]   ;;  %v1648_v4 = vld [vmem:[#allocation3 + $0x8] sm:$0xff]   ;;  %vm1441_vm7 = vcmask 261120  }
 0x916   : > { %1407 = vperm.xlu1 %1750, %v1372_v55   ;;  %1386 = vperm.xlu0 %1749, %v1372_v55   ;;  %v1653_v41 = vunpack.c.l.bf16 %v1658_v7  ;;  %v1654_v12 = vunpack.c.h.bf16 %v1658_v7  ;;  %v1650_v15 = vunpack.c.h.bf16 %v1648_v4  ;;  %v1649_v20 = vunpack.c.l.bf16 %v1648_v4  ;;  %v1618_v38 = vld [vmem:[%s2161_s5] sm:$0xff] }
 0x917   : > { %1751 = vset.pattern.permute.xlu2 %v1806_v24 }
 0x918   : > { %1376 = vperm.xlu2 %1751, %v1370_v34  }
 0x91e   : > { %1411 = vperm.xlu1 %1750, %v1373_v36   ;;  %1391 = vperm.xlu0 %1749, %v1373_v36  }
 0x920   : > { %1381 = vperm.xlu2 %1751, %v1371_v50  }
 0x926   : > { %1752 = vset.pattern.permute.xlu0 %v1805_v63  ;;  %1403 = vperm.xlu1 %1750, %v1371_v50  }
 0x927   : > { %1399 = vperm.xlu0 %1752, %v1370_v34  }
 0x928   : > { %1753 = vset.pattern.permute.xlu2 %v1807_v6 }
 0x929   : > { %1433 = vperm.xlu2 %1753, %v1876_v1  }
 0x92e   : > { %1754 = vset.pattern.permute.xlu1 %v1807_v6 }
 0x92f   : > { %1428 = vperm.xlu1 %1754, %v1871_v0   ;;  %1755 = vset.pattern.permute.xlu0 %v1807_v6 }
 0x972   : > { %v1377_v46 = vpop.permute.xlu2 %1376 }
 0x973   : > { %v1394_v28 = vmul.f32 %v1649_v20, %v1377_v46 }
 0x97a   : > { %v1382_v22 = vpop.permute.xlu2 %1381 }
 0x97b   : > { %v1395_v1 = vmul.f32 %v1650_v15, %v1382_v22 }
 0x983   : > { %v1434_v45 = vpop.permute.xlu2 %1433 }
 0x988   : > { %v1408_v8 = vpop.permute.xlu1 %1407  ;;  %v1387_v26 = vpop.permute.xlu0 %1386 }
 0x989   : > { %v1396_v10 = vmul.f32 %v1653_v41, %v1387_v26 }
 0x98b   : > { %v1416_v11 = vadd.f32 %v1408_v8, %v1396_v10 }
 0x98d   : > { %v1420_v0 = vmax.f32 %v1416_v11, 0.0 }
 0x990   : > { %v1412_v14 = vpop.permute.xlu1 %1411  ;;  %v1392_v56 = vpop.permute.xlu0 %1391 }
 0x991   : > { %v1397_v5 = vmul.f32 %v1654_v12, %v1392_v56 }
 0x993   : > { %v1417_v16 = vadd.f32 %v1412_v14, %v1397_v5 }
 0x995   : > { %v1421_v47 = vmax.f32 %v1417_v16, 0.0 }
 0x997   : > { %v1425_v27 = vpack.c.bf16 %v1421_v47, %v1420_v0 }
 0x998   : > { %v1404_v29 = vpop.permute.xlu1 %1403 }
 0x999   : > { %v1415_v30 = vadd.f32 %v1404_v29, %v1395_v1  ;;  %v1400_v31 = vpop.permute.xlu0 %1399  ;;  %1451 = vmatpush.bf16.msra.mxu0 %v1425_v27 }
 0x99a   : > { %v1414_v32 = vadd.f32 %v1400_v31, %v1394_v28 }
 0x99b   : > { %v1419_v33 = vmax.f32 %v1415_v30, 0.0 }
 0x99c   : > { %v1418_v9 = vmax.f32 %v1414_v32, 0.0 }
 0x99e   : > { %v1424_v19 = vpack.c.bf16 %v1419_v33, %v1418_v9 }
 0x9a0   : > { %1452 = vmatpush.bf16.msra.mxu0 %v1424_v19 }
 0x9a1   : > { %v1429_v42 = vpop.permute.xlu1 %1428 }
 0x9a3   : > { %1609 = vmatmul.msk.bf16.vlgmr.msra.gmra.mxu0 %vm1441_vm7, %v1618_v38 }
 0xa20   : > { %v1454_v44 = vpop.f32.mrf.mxu0 }
 0xa21   : > { %v1455_v53 = vadd.f32 %v1454_v44, %v1429_v42 }
 0xa23   : > { %1459 = vst [vmem:[%s2163_s7] sm:$0xff] %v1455_v53 }
 0xa28   : > { %v1456_v17 = vpop.f32.mrf.mxu0 }
 0xa29   : > { %v1457_v48 = vadd.f32 %v1456_v17, %v1434_v45 }
 0xa2b   : > { %v1461_v13 = vand.u32 2147483647, %v1457_v48  ;;  %v1460_v35 = vmax.f32 %v1457_v48, 0.0 }
 0xa2d   : > { %v1462_v49 = vsub.f32 0.0, %v1461_v13 }
 0xa2f   : > { %v1463_v21 = vmul.f32 1.442695, %v1462_v49 }
 0xa31   : > { %1756 = vpow2.f32 %v1463_v21 }
 0xa37   : > { %v1757_v37 = vpop.eup %1756 }
 0xa38   : > { %v1465_v54 = vadd.f32 1.0, %v1757_v37 }
 0xa3a   : > { %1758 = vlog2.f32 %v1465_v54 }
 0xa40   : > { %v1759_v52 = vpop.eup %1758 }
 0xa41   : > { %v1467_v57 = vmul.f32 0.6931472, %v1759_v52 }
 0xa43   : > { %v1468_v40 = vadd.f32 %v1467_v57, %v1460_v35 }
 0xa45   : > { %v1469_v58 = vadd.f32 1e-08, %v1468_v40 }
 0xa47   : > { %1470 = vst [vmem:[%s2163_s7 + $0x8] sm:$0xff] %v1469_v58 }
 0xa48 PF: > { %s17_s26 = sadd.s32 1, %s1782_s26   ;;  %s2164_s24 = smov %s1778_s25 }
 0xa49   : > { %p14_p7 = scmp.ge.s32.totalorder %s17_s26, 5   ;;  %s2165_s25 = smov %s2167_s27 }
 0xa4b   :  { %16 = sbr.rel (!%p14_p7) target bundleno = 2 (0x2), region = 120 }

</bundles_post_ra>
